<compile_context>
chip_gen: v5e
topology: v5e:2x2
jax: 0.10.0
libtpu: 0.0.40
codegen_flags: <defaults>
</compile_context>

<pallas_src>
import functools

import jax
import jax.numpy as jnp
from jax.experimental import pallas as pl
from jax.experimental.pallas import tpu as pltpu


def _round_up(x, m):
    return (x + m - 1) // m * m


# ----------------------------------------------------------------------------
# Pallas kernels
# ----------------------------------------------------------------------------

def _norm_quant_kernel(x_ref, m_ref, s_ref, o_ref):
    """(x - mean) / std, then emulate ToPILImage (float->uint8) + ToTensor."""
    y = (x_ref[...] - m_ref[...]) / s_ref[...]
    # TODO(synk): torchvision ToPILImage does mul(255).byte() (wraps on
    # overflow); we clip instead of wrapping.
    y = jnp.clip(jnp.floor(y * 255.0), 0.0, 255.0) * (1.0 / 255.0)
    o_ref[...] = y


def _gemm_bias_kernel(a_ref, b_ref, bias_ref, o_ref, *, relu):
    # bf16 MXU matmul, f32 accumulate + f32 epilogue (bias / ReLU).
    acc = jnp.dot(a_ref[...], b_ref[...], preferred_element_type=jnp.float32)
    acc = acc + bias_ref[...]
    if relu:
        acc = jnp.maximum(acc, 0.0)
    o_ref[...] = acc


def _gemm_res_kernel(a_ref, b_ref, bias_ref, r_ref, o_ref, *, relu):
    acc = jnp.dot(a_ref[...], b_ref[...], preferred_element_type=jnp.float32)
    acc = acc + bias_ref[...] + r_ref[...]
    if relu:
        acc = jnp.maximum(acc, 0.0)
    o_ref[...] = acc


def _gap_fc_kernel(h_ref, w_ref, b_ref, o_ref, *, inv_hw):
    # h: (B, HW, C) -> pooled (B, C) -> logits (B, num_classes)
    pooled = jnp.sum(h_ref[...], axis=1) * inv_hw
    logits = jnp.dot(pooled, w_ref[...], preferred_element_type=jnp.float32)
    o_ref[...] = logits + b_ref[...]


# ----------------------------------------------------------------------------
# Pallas wrappers
# ----------------------------------------------------------------------------

def normalize_quantize_nchw(x_nchw, mean_c, std_c):
    """Lane-dense normalize+quantize on the native NCHW slab (no transposes)."""
    B, C, H, W = x_nchw.shape
    R, L = B * C, H * W
    x2 = x_nchw.reshape(R, L)
    m = jnp.tile(mean_c.astype(jnp.float32), B).reshape(R, 1)
    s = jnp.tile(std_c.astype(jnp.float32), B).reshape(R, 1)
    y = pl.pallas_call(
        _norm_quant_kernel,
        out_shape=jax.ShapeDtypeStruct((R, L), jnp.float32),
        grid=(1,),
        in_specs=[pl.BlockSpec((R, L), lambda i: (0, 0)),
                  pl.BlockSpec((R, 1), lambda i: (0, 0)),
                  pl.BlockSpec((R, 1), lambda i: (0, 0))],
        out_specs=pl.BlockSpec((R, L), lambda i: (0, 0)),
    )(x2, m, s)
    return y.reshape(B, C, H, W)


def fused_gemm(a, b, bias, residual=None, relu=False, tm=512):
    """out = relu((a @ b) + bias [+ residual]), tiled over M.

    a: (M, K) activations/patches (bf16, K zero-padded to 128-mult)
    b: (K, N) folded weights      (bf16, K/N zero-padded)
    bias/residual/epilogue stay f32.  Output sliced back to (M, N) f32.
    """
    M, K = a.shape
    Kb, N = b.shape
    assert K == Kb
    K_pad = _round_up(K, 128)
    N_pad = _round_up(N, 128)
    tm = min(tm, _round_up(M, 16))          # 16-aligned (bf16 sublane packing)
    M_pad = _round_up(M, tm)
    grid_m = M_pad // tm

    # Pad in native dtype, cast straight to bf16 (no f32 round trip in HBM).
    a_p = jnp.pad(a.astype(jnp.bfloat16), ((0, M_pad - M), (0, K_pad - K)))
    b_p = jnp.pad(b.astype(jnp.bfloat16), ((0, K_pad - K), (0, N_pad - N)))
    bias_p = jnp.pad(bias.astype(jnp.float32), (0, N_pad - N)).reshape(1, N_pad)

    in_specs = [pl.BlockSpec((tm, K_pad), lambda i: (i, 0)),
                pl.BlockSpec((K_pad, N_pad), lambda i: (0, 0)),
                pl.BlockSpec((1, N_pad), lambda i: (0, 0))]
    if residual is None:
        kern = functools.partial(_gemm_bias_kernel, relu=relu)
        args = (a_p, b_p, bias_p)
    else:
        r_p = jnp.pad(residual.astype(jnp.float32),
                      ((0, M_pad - M), (0, N_pad - N)))
        in_specs = in_specs + [pl.BlockSpec((tm, N_pad), lambda i: (i, 0))]
        kern = functools.partial(_gemm_res_kernel, relu=relu)
        args = (a_p, b_p, bias_p, r_p)

    out = pl.pallas_call(
        kern,
        out_shape=jax.ShapeDtypeStruct((M_pad, N_pad), jnp.float32),
        grid=(grid_m,),
        in_specs=in_specs,
        out_specs=pl.BlockSpec((tm, N_pad), lambda i: (i, 0)),
        compiler_params=pltpu.CompilerParams(
            dimension_semantics=("parallel",),
            vmem_limit_bytes=32 * 1024 * 1024),
    )(*args)
    return out[:M, :N]


def gap_fc(h_nhwc, fc_w, fc_b):
    """Fused global-average-pool + fc + bias (single pallas_call, no transpose)."""
    B, Ho, Wo, C = h_nhwc.shape
    HW = Ho * Wo
    h3 = h_nhwc.reshape(B, HW, C)           # free reshape, channels stay last
    NC = fc_w.shape[1]
    return pl.pallas_call(
        functools.partial(_gap_fc_kernel, inv_hw=1.0 / float(HW)),
        out_shape=jax.ShapeDtypeStruct((B, NC), jnp.float32),
        grid=(1,),
        in_specs=[pl.BlockSpec((B, HW, C), lambda i: (0, 0, 0)),
                  pl.BlockSpec((C, NC), lambda i: (0, 0)),
                  pl.BlockSpec((1, NC), lambda i: (0, 0))],
        out_specs=pl.BlockSpec((B, NC), lambda i: (0, 0)),
    )(h3, fc_w.astype(jnp.float32), fc_b.reshape(1, NC).astype(jnp.float32))


# ----------------------------------------------------------------------------
# Glue: im2col, conv+BN folding, model forward
# ----------------------------------------------------------------------------

def im2col(x_nhwc, kh, kw, stride, pad):
    """Patch extraction (glue; patches materialized in bf16)."""
    B, H, W, C = x_nhwc.shape
    xp = jnp.pad(x_nhwc, ((0, 0), (pad, pad), (pad, pad), (0, 0)))
    Hp, Wp = H + 2 * pad, W + 2 * pad
    Ho = (Hp - kh) // stride + 1
    Wo = (Wp - kw) // stride + 1
    cols = []
    for i in range(kh):
        for j in range(kw):
            cols.append(xp[:, i:i + Ho * stride:stride,
                           j:j + Wo * stride:stride, :])
    patches = jnp.stack(cols, axis=3)               # (B, Ho, Wo, kh*kw, C)
    return patches.reshape(B * Ho * Wo, kh * kw * C), Ho, Wo, B


def conv2d_bn_act(x_nhwc, w_oihw, bias_o, bn, *, stride=1, pad=1,
                  relu=True, residual=None):
    gamma, beta, mu, var, eps = bn
    scale = gamma / jnp.sqrt(var + eps)             # (Cout,)
    # fold BN into conv weight/bias (parameter setup = glue)
    w = jnp.transpose(w_oihw, (2, 3, 1, 0)) * scale        # (kh, kw, Cin, Cout)
    b = (bias_o - mu) * scale + beta
    kh, kw, cin, cout = w.shape
    # Build patches directly in bf16: halves patch HBM traffic and removes the
    # f32->bf16 cast copy that previously preceded the GEMM.
    patches, Ho, Wo, B = im2col(x_nhwc.astype(jnp.bfloat16), kh, kw, stride, pad)
    w2 = w.reshape(kh * kw * cin, cout)
    res2 = None if residual is None else residual.reshape(B * Ho * Wo, cout)
    y = fused_gemm(patches, w2, b, residual=res2, relu=relu)
    return y.reshape(B, Ho, Wo, cout)


def init_params(key, c_in=3, width=16, num_classes=10):
    ks = jax.random.split(key, 8)
    def conv_w(k, co, ci):
        return (jax.random.normal(k, (co, ci, 3, 3), jnp.float32)
                * (1.0 / (3.0 * jnp.sqrt(float(ci)))))
    def bn(k, c):
        g = 1.0 + 0.01 * jax.random.normal(k, (c,), jnp.float32)
        beta = 0.01 * jnp.arange(c, dtype=jnp.float32)
        mu = 0.01 * jnp.ones((c,), jnp.float32)
        var = jnp.ones((c,), jnp.float32)
        return (g, beta, mu, var, 1e-5)
    return {
        "stem_w": conv_w(ks[0], width, c_in),
        "stem_b": jnp.zeros((width,), jnp.float32),
        "stem_bn": bn(ks[1], width),
        "b1c1_w": conv_w(ks[2], width, width),
        "b1c1_b": jnp.zeros((width,), jnp.float32),
        "b1c1_bn": bn(ks[3], width),
        "b1c2_w": conv_w(ks[4], width, width),
        "b1c2_b": jnp.zeros((width,), jnp.float32),
        "b1c2_bn": bn(ks[5], width),
        "fc_w": jax.random.normal(ks[6], (width, num_classes), jnp.float32)
                * (1.0 / jnp.sqrt(float(width))),
        "fc_b": 0.01 * jnp.arange(num_classes, dtype=jnp.float32),
    }


def rand_aug_resnet_eval(x_nchw, params, min_values, scale_values, input_size):
    """Eval-mode forward of RandAugResnet (per-sample eval_transform + model)."""
    x_nchw = x_nchw.astype(jnp.float32)
    B, C, H, W = x_nchw.shape

    # --- transforms.Normalize + ToPILImage/ToTensor quantization (Pallas) ---
    x = normalize_quantize_nchw(x_nchw, min_values, scale_values)    # NCHW
    x = jnp.transpose(x, (0, 2, 3, 1))                               # NHWC

    # --- transforms.Resize((input_size, input_size)) ------------------------
    # TODO(synk): PIL bilinear on uint8 images approximated by jax bilinear.
    x = jax.image.resize(x, (B, input_size, input_size, C), method="bilinear")

    # --- model: tiny ResNet (all matmuls / reductions in Pallas) ------------
    h = conv2d_bn_act(x, params["stem_w"], params["stem_b"],
                      params["stem_bn"], relu=True)
    r = h
    h = conv2d_bn_act(h, params["b1c1_w"], params["b1c1_b"],
                      params["b1c1_bn"], relu=True)
    h = conv2d_bn_act(h, params["b1c2_w"], params["b1c2_b"],
                      params["b1c2_bn"], relu=True, residual=r)

    # --- fused global-average-pool + fc --------------------------------------
    logits = gap_fc(h, params["fc_w"], params["fc_b"])
    return logits


# ----------------------------------------------------------------------------
# Demo
# ----------------------------------------------------------------------------

if __name__ == "__main__":
    key = jax.random.PRNGKey(0)
    k_x, k_p = jax.random.split(key)

    B, C, H, W = 2, 3, 16, 16          # small NCHW image batch
    input_size = 8                      # eval_transform resize target
    x = jax.random.uniform(k_x, (B, C, H, W), jnp.float32)

    min_values = jnp.array([0.485, 0.456, 0.406], jnp.float32)
    scale_values = jnp.array([0.229, 0.224, 0.225], jnp.float32)

    params = init_params(k_p, c_in=C, width=16, num_classes=10)

    fwd = jax.jit(functools.partial(rand_aug_resnet_eval,
                                    input_size=input_size))
    logits = fwd(x, params, min_values, scale_values)
    logits = jax.block_until_ready(logits)
    assert logits.shape == (B, 10) and logits.dtype == jnp.float32
    print("KERNEL_OK")
</pallas_src>

<mosaic_0001>
module attributes {stable_mosaic.version = 11 : i64} {
  func.func @_norm_quant_kernel(%arg0: i32, %arg1: memref<6x256xf32, #tpu.memory_space<vmem>>, %arg2: memref<6x1xf32, #tpu.memory_space<vmem>>, %arg3: memref<6x1xf32, #tpu.memory_space<vmem>>, %arg4: memref<6x256xf32, #tpu.memory_space<vmem>>) attributes {dimension_semantics = [#tpu.dimension_semantics<arbitrary>], iteration_bounds = array<i64: 1>, scalar_prefetch = 0 : i64, scratch_operands = 0 : i64, tpu.core_type = #tpu.core_type<tc>, window_params = [{pipeline_mode = #tpu.pipeline_mode<synchronous>, transform_indices = @transform_0, window_bounds = array<i64: 6, 256>}, {pipeline_mode = #tpu.pipeline_mode<synchronous>, transform_indices = @transform_1, window_bounds = array<i64: 6, 1>}, {pipeline_mode = #tpu.pipeline_mode<synchronous>, transform_indices = @transform_2, window_bounds = array<i64: 6, 1>}, {pipeline_mode = #tpu.pipeline_mode<synchronous>, transform_indices = @transform_3, window_bounds = array<i64: 6, 256>}]} {
    %c0 = arith.constant 0 : index
    %c0_0 = arith.constant 0 : index
    %0 = vector.load %arg1[%c0, %c0_0] : memref<6x256xf32, #tpu.memory_space<vmem>>, vector<6x256xf32>
    %c0_1 = arith.constant 0 : index
    %c0_2 = arith.constant 0 : index
    %1 = vector.load %arg2[%c0_1, %c0_2] : memref<6x1xf32, #tpu.memory_space<vmem>>, vector<6x1xf32>
    %2 = vector.broadcast %1 : vector<6x1xf32> to vector<6x256xf32>
    %3 = arith.subf %0, %2 : vector<6x256xf32>
    %c0_3 = arith.constant 0 : index
    %c0_4 = arith.constant 0 : index
    %4 = vector.load %arg3[%c0_3, %c0_4] : memref<6x1xf32, #tpu.memory_space<vmem>>, vector<6x1xf32>
    %5 = vector.broadcast %4 : vector<6x1xf32> to vector<6x256xf32>
    %6 = arith.divf %3, %5 : vector<6x256xf32>
    %cst = arith.constant 2.550000e+02 : f32
    %7 = vector.broadcast %cst : f32 to vector<6x256xf32>
    %8 = arith.mulf %6, %7 : vector<6x256xf32>
    %9 = math.floor %8 : vector<6x256xf32>
    %cst_5 = arith.constant 0.000000e+00 : f32
    %cst_6 = arith.constant 2.550000e+02 : f32
    %10 = vector.broadcast %cst_5 : f32 to vector<6x256xf32>
    %11 = arith.maximumf %10, %9 : vector<6x256xf32>
    %12 = vector.broadcast %cst_6 : f32 to vector<6x256xf32>
    %13 = arith.minimumf %12, %11 : vector<6x256xf32>
    %cst_7 = arith.constant 0.00392156886 : f32
    %14 = vector.broadcast %cst_7 : f32 to vector<6x256xf32>
    %15 = arith.mulf %13, %14 : vector<6x256xf32>
    %c0_8 = arith.constant 0 : index
    %c0_9 = arith.constant 0 : index
    %16 = vector.load %arg4[%c0_8, %c0_9] : memref<6x256xf32, #tpu.memory_space<vmem>>, vector<6x256xf32>
    tpu.vector_store %arg4[%c0_8, %c0_9], %15 {strides = array<i32>} : memref<6x256xf32, #tpu.memory_space<vmem>>, vector<6x256xf32>,
    return
  }
  func.func @transform_0(%arg0: i32) -> (i32, i32) {
    %c0_i32 = arith.constant 0 : i32
    %c0_i32_0 = arith.constant 0 : i32
    %c0_i32_1 = arith.constant 0 : i32
    return %c0_i32, %c0_i32_0 : i32, i32
  }
  func.func @transform_1(%arg0: i32) -> (i32, i32) {
    %c0_i32 = arith.constant 0 : i32
    %c0_i32_0 = arith.constant 0 : i32
    %c0_i32_1 = arith.constant 0 : i32
    return %c0_i32, %c0_i32_0 : i32, i32
  }
  func.func @transform_2(%arg0: i32) -> (i32, i32) {
    %c0_i32 = arith.constant 0 : i32
    %c0_i32_0 = arith.constant 0 : i32
    %c0_i32_1 = arith.constant 0 : i32
    return %c0_i32, %c0_i32_0 : i32, i32
  }
  func.func @transform_3(%arg0: i32) -> (i32, i32) {
    %c0_i32 = arith.constant 0 : i32
    %c0_i32_0 = arith.constant 0 : i32
    %c0_i32_1 = arith.constant 0 : i32
    return %c0_i32, %c0_i32_0 : i32, i32
  }
}

module attributes {stable_mosaic.version = 11 : i64} {
  func.func @_gemm_bias_kernel(%arg0: i32, %arg1: memref<128x128xbf16, #tpu.memory_space<vmem>>, %arg2: memref<128x128xbf16, #tpu.memory_space<vmem>>, %arg3: memref<1x128xf32, #tpu.memory_space<vmem>>, %arg4: memref<128x128xf32, #tpu.memory_space<vmem>>) attributes {dimension_semantics = [#tpu.dimension_semantics<parallel>], iteration_bounds = array<i64: 1>, scalar_prefetch = 0 : i64, scratch_operands = 0 : i64, tpu.core_type = #tpu.core_type<tc>, window_params = [{transform_indices = @transform_0, window_bounds = array<i64: 128, 128>}, {pipeline_mode = #tpu.pipeline_mode<synchronous>, transform_indices = @transform_1, window_bounds = array<i64: 128, 128>}, {pipeline_mode = #tpu.pipeline_mode<synchronous>, transform_indices = @transform_2, window_bounds = array<i64: 1, 128>}, {transform_indices = @transform_3, window_bounds = array<i64: 128, 128>}]} {
    %c0 = arith.constant 0 : index
    %c0_0 = arith.constant 0 : index
    %0 = vector.load %arg1[%c0, %c0_0] : memref<128x128xbf16, #tpu.memory_space<vmem>>, vector<128x128xbf16>
    %c0_1 = arith.constant 0 : index
    %c0_2 = arith.constant 0 : index
    %1 = vector.load %arg2[%c0_1, %c0_2] : memref<128x128xbf16, #tpu.memory_space<vmem>>, vector<128x128xbf16>
    %cst = arith.constant dense<0.000000e+00> : vector<128x128xf32>
    %2 = tpu.matmul %0, %1, %cst {dimension_numbers = #tpu.dot_dimension_numbers<[1], [0], [0], [1], [0, 0, 1, 1], [], []>} : vector<128x128xbf16>, vector<128x128xbf16>, vector<128x128xf32> -> vector<128x128xf32>
    %c0_3 = arith.constant 0 : index
    %c0_4 = arith.constant 0 : index
    %3 = vector.load %arg3[%c0_3, %c0_4] : memref<1x128xf32, #tpu.memory_space<vmem>>, vector<1x128xf32>
    %4 = vector.broadcast %3 : vector<1x128xf32> to vector<128x128xf32>
    %5 = arith.addf %2, %4 : vector<128x128xf32>
    %cst_5 = arith.constant 0.000000e+00 : f32
    %6 = vector.broadcast %cst_5 : f32 to vector<128x128xf32>
    %7 = arith.maximumf %5, %6 : vector<128x128xf32>
    %c0_6 = arith.constant 0 : index
    %c0_7 = arith.constant 0 : index
    %8 = vector.load %arg4[%c0_6, %c0_7] : memref<128x128xf32, #tpu.memory_space<vmem>>, vector<128x128xf32>
    tpu.vector_store %arg4[%c0_6, %c0_7], %7 {strides = array<i32>} : memref<128x128xf32, #tpu.memory_space<vmem>>, vector<128x128xf32>,
    return
  }
  func.func @transform_0(%arg0: i32) -> (i32, i32) {
    %c0_i32 = arith.constant 0 : i32
    %c0_i32_0 = arith.constant 0 : i32
    return %arg0, %c0_i32 : i32, i32
  }
  func.func @transform_1(%arg0: i32) -> (i32, i32) {
    %c0_i32 = arith.constant 0 : i32
    %c0_i32_0 = arith.constant 0 : i32
    %c0_i32_1 = arith.constant 0 : i32
    return %c0_i32, %c0_i32_0 : i32, i32
  }
  func.func @transform_2(%arg0: i32) -> (i32, i32) {
    %c0_i32 = arith.constant 0 : i32
    %c0_i32_0 = arith.constant 0 : i32
    %c0_i32_1 = arith.constant 0 : i32
    return %c0_i32, %c0_i32_0 : i32, i32
  }
  func.func @transform_3(%arg0: i32) -> (i32, i32) {
    %c0_i32 = arith.constant 0 : i32
    %c0_i32_0 = arith.constant 0 : i32
    return %arg0, %c0_i32 : i32, i32
  }
}

module attributes {stable_mosaic.version = 11 : i64} {
  func.func @_gemm_bias_kernel(%arg0: i32, %arg1: memref<128x256xbf16, #tpu.memory_space<vmem>>, %arg2: memref<256x128xbf16, #tpu.memory_space<vmem>>, %arg3: memref<1x128xf32, #tpu.memory_space<vmem>>, %arg4: memref<128x128xf32, #tpu.memory_space<vmem>>) attributes {dimension_semantics = [#tpu.dimension_semantics<parallel>], iteration_bounds = array<i64: 1>, scalar_prefetch = 0 : i64, scratch_operands = 0 : i64, tpu.core_type = #tpu.core_type<tc>, window_params = [{transform_indices = @transform_0, window_bounds = array<i64: 128, 256>}, {pipeline_mode = #tpu.pipeline_mode<synchronous>, transform_indices = @transform_1, window_bounds = array<i64: 256, 128>}, {pipeline_mode = #tpu.pipeline_mode<synchronous>, transform_indices = @transform_2, window_bounds = array<i64: 1, 128>}, {transform_indices = @transform_3, window_bounds = array<i64: 128, 128>}]} {
    %c0 = arith.constant 0 : index
    %c0_0 = arith.constant 0 : index
    %0 = vector.load %arg1[%c0, %c0_0] : memref<128x256xbf16, #tpu.memory_space<vmem>>, vector<128x256xbf16>
    %c0_1 = arith.constant 0 : index
    %c0_2 = arith.constant 0 : index
    %1 = vector.load %arg2[%c0_1, %c0_2] : memref<256x128xbf16, #tpu.memory_space<vmem>>, vector<256x128xbf16>
    %cst = arith.constant dense<0.000000e+00> : vector<128x128xf32>
    %2 = tpu.matmul %0, %1, %cst {dimension_numbers = #tpu.dot_dimension_numbers<[1], [0], [0], [1], [0, 0, 1, 1], [], []>} : vector<128x256xbf16>, vector<256x128xbf16>, vector<128x128xf32> -> vector<128x128xf32>
    %c0_3 = arith.constant 0 : index
    %c0_4 = arith.constant 0 : index
    %3 = vector.load %arg3[%c0_3, %c0_4] : memref<1x128xf32, #tpu.memory_space<vmem>>, vector<1x128xf32>
    %4 = vector.broadcast %3 : vector<1x128xf32> to vector<128x128xf32>
    %5 = arith.addf %2, %4 : vector<128x128xf32>
    %cst_5 = arith.constant 0.000000e+00 : f32
    %6 = vector.broadcast %cst_5 : f32 to vector<128x128xf32>
    %7 = arith.maximumf %5, %6 : vector<128x128xf32>
    %c0_6 = arith.constant 0 : index
    %c0_7 = arith.constant 0 : index
    %8 = vector.load %arg4[%c0_6, %c0_7] : memref<128x128xf32, #tpu.memory_space<vmem>>, vector<128x128xf32>
    tpu.vector_store %arg4[%c0_6, %c0_7], %7 {strides = array<i32>} : memref<128x128xf32, #tpu.memory_space<vmem>>, vector<128x128xf32>,
    return
  }
  func.func @transform_0(%arg0: i32) -> (i32, i32) {
    %c0_i32 = arith.constant 0 : i32
    %c0_i32_0 = arith.constant 0 : i32
    return %arg0, %c0_i32 : i32, i32
  }
  func.func @transform_1(%arg0: i32) -> (i32, i32) {
    %c0_i32 = arith.constant 0 : i32
    %c0_i32_0 = arith.constant 0 : i32
    %c0_i32_1 = arith.constant 0 : i32
    return %c0_i32, %c0_i32_0 : i32, i32
  }
  func.func @transform_2(%arg0: i32) -> (i32, i32) {
    %c0_i32 = arith.constant 0 : i32
    %c0_i32_0 = arith.constant 0 : i32
    %c0_i32_1 = arith.constant 0 : i32
    return %c0_i32, %c0_i32_0 : i32, i32
  }
  func.func @transform_3(%arg0: i32) -> (i32, i32) {
    %c0_i32 = arith.constant 0 : i32
    %c0_i32_0 = arith.constant 0 : i32
    return %arg0, %c0_i32 : i32, i32
  }
}

module attributes {stable_mosaic.version = 11 : i64} {
  func.func @_gemm_res_kernel(%arg0: i32, %arg1: memref<128x256xbf16, #tpu.memory_space<vmem>>, %arg2: memref<256x128xbf16, #tpu.memory_space<vmem>>, %arg3: memref<1x128xf32, #tpu.memory_space<vmem>>, %arg4: memref<128x128xf32, #tpu.memory_space<vmem>>, %arg5: memref<128x128xf32, #tpu.memory_space<vmem>>) attributes {dimension_semantics = [#tpu.dimension_semantics<parallel>], iteration_bounds = array<i64: 1>, scalar_prefetch = 0 : i64, scratch_operands = 0 : i64, tpu.core_type = #tpu.core_type<tc>, window_params = [{transform_indices = @transform_0, window_bounds = array<i64: 128, 256>}, {pipeline_mode = #tpu.pipeline_mode<synchronous>, transform_indices = @transform_1, window_bounds = array<i64: 256, 128>}, {pipeline_mode = #tpu.pipeline_mode<synchronous>, transform_indices = @transform_2, window_bounds = array<i64: 1, 128>}, {transform_indices = @transform_3, window_bounds = array<i64: 128, 128>}, {transform_indices = @transform_4, window_bounds = array<i64: 128, 128>}]} {
    %c0 = arith.constant 0 : index
    %c0_0 = arith.constant 0 : index
    %0 = vector.load %arg1[%c0, %c0_0] : memref<128x256xbf16, #tpu.memory_space<vmem>>, vector<128x256xbf16>
    %c0_1 = arith.constant 0 : index
    %c0_2 = arith.constant 0 : index
    %1 = vector.load %arg2[%c0_1, %c0_2] : memref<256x128xbf16, #tpu.memory_space<vmem>>, vector<256x128xbf16>
    %cst = arith.constant dense<0.000000e+00> : vector<128x128xf32>
    %2 = tpu.matmul %0, %1, %cst {dimension_numbers = #tpu.dot_dimension_numbers<[1], [0], [0], [1], [0, 0, 1, 1], [], []>} : vector<128x256xbf16>, vector<256x128xbf16>, vector<128x128xf32> -> vector<128x128xf32>
    %c0_3 = arith.constant 0 : index
    %c0_4 = arith.constant 0 : index
    %3 = vector.load %arg3[%c0_3, %c0_4] : memref<1x128xf32, #tpu.memory_space<vmem>>, vector<1x128xf32>
    %4 = vector.broadcast %3 : vector<1x128xf32> to vector<128x128xf32>
    %5 = arith.addf %2, %4 : vector<128x128xf32>
    %c0_5 = arith.constant 0 : index
    %c0_6 = arith.constant 0 : index
    %6 = vector.load %arg4[%c0_5, %c0_6] : memref<128x128xf32, #tpu.memory_space<vmem>>, vector<128x128xf32>
    %7 = arith.addf %5, %6 : vector<128x128xf32>
    %cst_7 = arith.constant 0.000000e+00 : f32
    %8 = vector.broadcast %cst_7 : f32 to vector<128x128xf32>
    %9 = arith.maximumf %7, %8 : vector<128x128xf32>
    %c0_8 = arith.constant 0 : index
    %c0_9 = arith.constant 0 : index
    %10 = vector.load %arg5[%c0_8, %c0_9] : memref<128x128xf32, #tpu.memory_space<vmem>>, vector<128x128xf32>
    tpu.vector_store %arg5[%c0_8, %c0_9], %9 {strides = array<i32>} : memref<128x128xf32, #tpu.memory_space<vmem>>, vector<128x128xf32>,
    return
  }
  func.func @transform_0(%arg0: i32) -> (i32, i32) {
    %c0_i32 = arith.constant 0 : i32
    %c0_i32_0 = arith.constant 0 : i32
    return %arg0, %c0_i32 : i32, i32
  }
  func.func @transform_1(%arg0: i32) -> (i32, i32) {
    %c0_i32 = arith.constant 0 : i32
    %c0_i32_0 = arith.constant 0 : i32
    %c0_i32_1 = arith.constant 0 : i32
    return %c0_i32, %c0_i32_0 : i32, i32
  }
  func.func @transform_2(%arg0: i32) -> (i32, i32) {
    %c0_i32 = arith.constant 0 : i32
    %c0_i32_0 = arith.constant 0 : i32
    %c0_i32_1 = arith.constant 0 : i32
    return %c0_i32, %c0_i32_0 : i32, i32
  }
  func.func @transform_3(%arg0: i32) -> (i32, i32) {
    %c0_i32 = arith.constant 0 : i32
    %c0_i32_0 = arith.constant 0 : i32
    return %arg0, %c0_i32 : i32, i32
  }
  func.func @transform_4(%arg0: i32) -> (i32, i32) {
    %c0_i32 = arith.constant 0 : i32
    %c0_i32_0 = arith.constant 0 : i32
    return %arg0, %c0_i32 : i32, i32
  }
}

module attributes {stable_mosaic.version = 11 : i64} {
  func.func @_gap_fc_kernel(%arg0: i32, %arg1: memref<2x64x16xf32, #tpu.memory_space<vmem>>, %arg2: memref<16x10xf32, #tpu.memory_space<vmem>>, %arg3: memref<1x10xf32, #tpu.memory_space<vmem>>, %arg4: memref<2x10xf32, #tpu.memory_space<vmem>>) attributes {dimension_semantics = [#tpu.dimension_semantics<arbitrary>], iteration_bounds = array<i64: 1>, scalar_prefetch = 0 : i64, scratch_operands = 0 : i64, tpu.core_type = #tpu.core_type<tc>, window_params = [{pipeline_mode = #tpu.pipeline_mode<synchronous>, transform_indices = @transform_0, window_bounds = array<i64: 2, 64, 16>}, {pipeline_mode = #tpu.pipeline_mode<synchronous>, transform_indices = @transform_1, window_bounds = array<i64: 16, 10>}, {pipeline_mode = #tpu.pipeline_mode<synchronous>, transform_indices = @transform_2, window_bounds = array<i64: 1, 10>}, {pipeline_mode = #tpu.pipeline_mode<synchronous>, transform_indices = @transform_3, window_bounds = array<i64: 2, 10>}]} {
    %c0 = arith.constant 0 : index
    %c0_0 = arith.constant 0 : index
    %c0_1 = arith.constant 0 : index
    %0 = vector.load %arg1[%c0, %c0_0, %c0_1] : memref<2x64x16xf32, #tpu.memory_space<vmem>>, vector<2x64x16xf32>
    %cst = arith.constant dense<0.000000e+00> : vector<2x16xf32>
    %1 = vector.multi_reduction <add>, %0, %cst [1] : vector<2x64x16xf32> to vector<2x16xf32>
    %cst_2 = arith.constant 1.562500e-02 : f32
    %2 = vector.broadcast %cst_2 : f32 to vector<2x16xf32>
    %3 = arith.mulf %1, %2 : vector<2x16xf32>
    %c0_3 = arith.constant 0 : index
    %c0_4 = arith.constant 0 : index
    %4 = vector.load %arg2[%c0_3, %c0_4] : memref<16x10xf32, #tpu.memory_space<vmem>>, vector<16x10xf32>
    %cst_5 = arith.constant dense<0.000000e+00> : vector<2x10xf32>
    %5 = tpu.matmul %3, %4, %cst_5 {dimension_numbers = #tpu.dot_dimension_numbers<[1], [0], [0], [1], [0, 0, 1, 1], [], []>} : vector<2x16xf32>, vector<16x10xf32>, vector<2x10xf32> -> vector<2x10xf32>
    %c0_6 = arith.constant 0 : index
    %c0_7 = arith.constant 0 : index
    %6 = vector.load %arg3[%c0_6, %c0_7] : memref<1x10xf32, #tpu.memory_space<vmem>>, vector<1x10xf32>
    %7 = vector.broadcast %6 : vector<1x10xf32> to vector<2x10xf32>
    %8 = arith.addf %5, %7 : vector<2x10xf32>
    %c0_8 = arith.constant 0 : index
    %c0_9 = arith.constant 0 : index
    %9 = vector.load %arg4[%c0_8, %c0_9] : memref<2x10xf32, #tpu.memory_space<vmem>>, vector<2x10xf32>
    tpu.vector_store %arg4[%c0_8, %c0_9], %8 {strides = array<i32>} : memref<2x10xf32, #tpu.memory_space<vmem>>, vector<2x10xf32>,
    return
  }
  func.func @transform_0(%arg0: i32) -> (i32, i32, i32) {
    %c0_i32 = arith.constant 0 : i32
    %c0_i32_0 = arith.constant 0 : i32
    %c0_i32_1 = arith.constant 0 : i32
    %c0_i32_2 = arith.constant 0 : i32
    return %c0_i32, %c0_i32_0, %c0_i32_1 : i32, i32, i32
  }
  func.func @transform_1(%arg0: i32) -> (i32, i32) {
    %c0_i32 = arith.constant 0 : i32
    %c0_i32_0 = arith.constant 0 : i32
    %c0_i32_1 = arith.constant 0 : i32
    return %c0_i32, %c0_i32_0 : i32, i32
  }
  func.func @transform_2(%arg0: i32) -> (i32, i32) {
    %c0_i32 = arith.constant 0 : i32
    %c0_i32_0 = arith.constant 0 : i32
    %c0_i32_1 = arith.constant 0 : i32
    return %c0_i32, %c0_i32_0 : i32, i32
  }
  func.func @transform_3(%arg0: i32) -> (i32, i32) {
    %c0_i32 = arith.constant 0 : i32
    %c0_i32_0 = arith.constant 0 : i32
    %c0_i32_1 = arith.constant 0 : i32
    return %c0_i32, %c0_i32_0 : i32, i32
  }
}

</mosaic_0001>

<bundles_post_ra>
// kernel: tile.13
= control target key start
LH: loop header
LB: loop body
LE: loop exit
PB: predicated region body
PF: predicated region fallthrough
CT: control target
= control target key end

     0   :  { %s22_s0 = inlined_call_operand.vmem [shape: f32[3], index: 0, kind: input, shape index: {}]   ;;  %s23_s1 = inlined_call_operand.vmem [shape: f32[2,3], index: 1, kind: output, shape index: {}]  }
   0x1   :  { %v4_v0 = vld [vmem:[%s22_s0] ss:$0 sm:$0xff] }
   0x2   :  { %5 = vst [vmem:[%s23_s1] sm:$0x3] %v4_v0 }

// kernel: tile.0
= control target key start
LH: loop header
LB: loop body
LE: loop exit
PB: predicated region body
PF: predicated region fallthrough
CT: control target
= control target key end

     0   :  { %s26_s8 = smov 126   ;;  %vm7_vm0 = vcmask 7168   ;;  %s49_s0 = inlined_call_operand.vmem [shape: f32[2,3], index: 0, kind: input, shape index: {}]   ;;  %s50_s1 = inlined_call_operand.vmem [shape: f32[6,1], index: 1, kind: output, shape index: {}]  }
   0x1   :  { %v4_v0 = vld [vmem:[%s49_s0] sm:$0x3]  ;;  %s25_s0 = smov 127  }
   0x2   :  { %5 = vst [vmem:[#allocation0] sm:$0x3] %v4_v0 }
   0x9   :  { %v9_v1 = vld [vmem:[#allocation0] sm:$0x3]  }
   0xa   :  { %10 = vrot.lane.b32.xlu0 %v9_v1, %s25_s0  ;;  %v15_v2 = vld [vmem:[#allocation0] sm:$0x3]  }
   0xb   :  { %v6_v3 = vld [vmem:[#allocation0] sm:$0x3]  }
   0xc   :  { %8 = vst.msk [vmem:[%s50_s1] ss:$3 sm:$0x3] %vm7_vm0, %v6_v3  }
  0x12   :  { %16 = vrot.lane.b32.xlu0 %v15_v2, %s26_s8 }
  0x7c   :  { %v11_v4 = vpop.permute.xlu0 %10  }
  0x7d   :  { %21 = vst.msk [vmem:[%s50_s1 + $0x1] ss:$3 sm:$0x3] %vm7_vm0, %v11_v4  }
  0x84   :  { %v17_v5 = vpop.permute.xlu0 %16  }
  0x85   :  { %22 = vst.msk [vmem:[%s50_s1 + $0x2] ss:$3 sm:$0x3] %vm7_vm0, %v17_v5  }

// kernel: rand_aug_resnet_eval.5
= control target key start
LH: loop header
LB: loop body
LE: loop exit
PB: predicated region body
PF: predicated region fallthrough
CT: control target
= control target key end

     0   :  { %v66_v0 = vmov 0   ;;  %s105_s2 = inlined_call_operand.vmem [shape: f32[6,1], index: 2, kind: input, shape index: {}]   ;;  %s106_s1 = inlined_call_operand.vmem [shape: f32[6,1], index: 1, kind: input, shape index: {}]   ;;  %s107_s0 = inlined_call_operand.vmem [shape: f32[6,256], index: 0, kind: input, shape index: {}]   ;;  %s108_s3 = inlined_call_operand.vmem [shape: f32[6,256], index: 3, kind: output, shape index: {}]  }
   0x1   :  { %63 = vset.pattern.permute.xlu0 %v66_v0  ;;  %v24_v1 = vld [vmem:[%s105_s2] sm:$0x3f]  ;;  %v15_v12 = vld [vmem:[%s107_s0 + $0x8] sm:$0x3f] }
   0x2   :  { %27 = vperm.xlu0 %63, %v24_v1   ;;  %v16_v2 = vld [vmem:[%s106_s1] sm:$0x3f] }
   0x3   :  { %v14_v11 = vld [vmem:[%s107_s0] sm:$0x3f] }
   0xa   :  { %19 = vperm.xlu0 %63, %v16_v2  }
  0x74   :  { %v28_v3 = vpop.permute.xlu0 %27 }
  0x75   :  { %64 = vrcp.f32 %v28_v3  ;;  %v41_v7 = vand.u32 2147483648, %v28_v3  ;;  %v39_v9 = vand.u32 2147483647, %v28_v3  ;;  %vm35_vm1 = vweird.f32 %v28_v3 }
  0x77   :  { %v42_v14 = vor.u32 1.1754944e-38, %v41_v7  ;;  %vm40_vm3 = vcmp.eq.f32.partialorder %v39_v9, 8.507059e+37 }
  0x7b   :  { %v65_v4 = vpop.eup %64 }
  0x7c   :  { %v31_v5 = vmul.f32 %v65_v4, %v28_v3  ;;  %vm36_vm0 = vweird.f32 %v65_v4  ;;  %v20_v10 = vpop.permute.xlu0 %19 }
  0x7d   :  { %vm37_vm2 = vmor %vm35_vm1, %vm36_vm0  ;;  %v22_v16 = vsub.f32 %v14_v11, %v20_v10  ;;  %v23_v17 = vsub.f32 %v15_v12, %v20_v10 }
  0x7e   :  { %v32_v6 = vsub.f32 1.0, %v31_v5 }
  0x80   :  { %v33_v8 = vmul.f32 %v65_v4, %v32_v6 }
  0x82   :  { %v34_v13 = vadd.f32 %v65_v4, %v33_v8 }
  0x84   :  { %v38_v15 = vsel %vm37_vm2, %v65_v4, %v34_v13 }
  0x85   :  { %v43_v18 = vsel %vm40_vm3, %v42_v14, %v38_v15 }
  0x86   :  { %v44_v19 = vmul.f32 %v43_v18, %v22_v16  ;;  %v45_v20 = vmul.f32 %v43_v18, %v23_v17 }
  0x88   :  { %v46_v21 = vmul.f32 255.0, %v44_v19  ;;  %v47_v22 = vmul.f32 255.0, %v45_v20 }
  0x8a   :  { %v48_v23 = vfloor.f32 %v46_v21  ;;  %v49_v24 = vfloor.f32 %v47_v22 }
  0x8c   :  { %v50_v25 = vmax.f32 %v48_v23, 0.0  ;;  %v51_v26 = vmax.f32 %v49_v24, 0.0 }
  0x8e   :  { %v52_v27 = vmin.f32 %v50_v25, 255.0  ;;  %v53_v28 = vmin.f32 %v51_v26, 255.0 }
  0x90   :  { %v54_v29 = vmul.f32 0.003921569, %v52_v27  ;;  %v55_v30 = vmul.f32 0.003921569, %v53_v28 }
  0x92   :  { %56 = vst [vmem:[%s108_s3] sm:$0x3f] %v54_v29 }
  0x93   :  { %57 = vst [vmem:[%s108_s3 + $0x8] sm:$0x3f] %v55_v30 }

// kernel: rand_aug_resnet_eval.6
= control target key start
LH: loop header
LB: loop body
LE: loop exit
PB: predicated region body
PF: predicated region fallthrough
CT: control target
= control target key end

     0   :  { %s455_s1 = inlined_call_operand.vmem [shape: bf16[128,128], index: 1, kind: input, shape index: {}]   ;;  %s456_s2 = inlined_call_operand.vmem [shape: f32[1,128], index: 2, kind: input, shape index: {}]   ;;  %s457_s0 = inlined_call_operand.vmem [shape: bf16[128,128], index: 0, kind: input, shape index: {}]   ;;  %s458_s3 = inlined_call_operand.vmem [shape: f32[128,128], index: 3, kind: output, shape index: {}]  }
   0x1   :  { %v310_v0 = vld [vmem:[%s455_s1 + $0x38] sm:$0xff]  ;;  %v309_v1 = vld [vmem:[%s455_s1 + $0x30] sm:$0xff]  ;;  %v308_v2 = vld [vmem:[%s455_s1 + $0x28] sm:$0xff] }
   0x2   :  { %146 = vmatpush.bf16.msra.mxu0 %v310_v0  ;;  %311 = vmatpush.bf16.msra.mxu1 %v310_v0  ;;  %v307_v3 = vld [vmem:[%s455_s1 + $0x20] sm:$0xff]  ;;  %v306_v4 = vld [vmem:[%s455_s1 + $0x18] sm:$0xff]  ;;  %v305_v5 = vld [vmem:[%s455_s1 + $0x10] sm:$0xff] }
   0x3   :  { %312 = vmatpush.bf16.msra.mxu2 %v310_v0  ;;  %313 = vmatpush.bf16.msra.mxu3 %v310_v0  ;;  %v304_v6 = vld [vmem:[%s455_s1 + $0x8] sm:$0xff]  ;;  %v303_v7 = vld [vmem:[%s455_s1] sm:$0xff]  ;;  %v297_v9 = vld [vmem:[%s457_s0 + $0x10] sm:$0xff] }
   0x4   :  { %v295_v8 = vld [vmem:[%s457_s0] sm:$0xff]  ;;  %v301_v11 = vld [vmem:[%s457_s0 + $0x30] sm:$0xff]  ;;  %v296_v12 = vld [vmem:[%s457_s0 + $0x8] sm:$0xff] }
   0x5   :  { %v299_v10 = vld [vmem:[%s457_s0 + $0x20] sm:$0xff]  ;;  %v298_v13 = vld [vmem:[%s457_s0 + $0x18] sm:$0xff]  ;;  %v300_v14 = vld [vmem:[%s457_s0 + $0x28] sm:$0xff] }
   0x6   :  { %147 = vmatpush.bf16.msra.mxu0 %v309_v1  ;;  %314 = vmatpush.bf16.msra.mxu1 %v309_v1  ;;  %v302_v15 = vld [vmem:[%s457_s0 + $0x38] sm:$0xff]  ;;  %v335_v16 = vld [vmem:[%s456_s2] ss:$0 sm:$0xff] }
   0x7   :  { %315 = vmatpush.bf16.msra.mxu2 %v309_v1  ;;  %316 = vmatpush.bf16.msra.mxu3 %v309_v1 }
   0xa   :  { %148 = vmatpush.bf16.msra.mxu0 %v308_v2  ;;  %317 = vmatpush.bf16.msra.mxu1 %v308_v2 }
   0xb   :  { %318 = vmatpush.bf16.msra.mxu2 %v308_v2  ;;  %319 = vmatpush.bf16.msra.mxu3 %v308_v2 }
   0xe   :  { %149 = vmatpush.bf16.msra.mxu0 %v307_v3  ;;  %320 = vmatpush.bf16.msra.mxu1 %v307_v3 }
   0xf   :  { %321 = vmatpush.bf16.msra.mxu2 %v307_v3  ;;  %322 = vmatpush.bf16.msra.mxu3 %v307_v3 }
  0x12   :  { %150 = vmatpush.bf16.msra.mxu0 %v306_v4  ;;  %323 = vmatpush.bf16.msra.mxu1 %v306_v4 }
  0x13   :  { %324 = vmatpush.bf16.msra.mxu2 %v306_v4  ;;  %325 = vmatpush.bf16.msra.mxu3 %v306_v4 }
  0x16   :  { %151 = vmatpush.bf16.msra.mxu0 %v305_v5  ;;  %326 = vmatpush.bf16.msra.mxu1 %v305_v5 }
  0x17   :  { %327 = vmatpush.bf16.msra.mxu2 %v305_v5  ;;  %328 = vmatpush.bf16.msra.mxu3 %v305_v5 }
  0x1a   :  { %152 = vmatpush.bf16.msra.mxu0 %v304_v6  ;;  %329 = vmatpush.bf16.msra.mxu1 %v304_v6 }
  0x1b   :  { %330 = vmatpush.bf16.msra.mxu2 %v304_v6  ;;  %331 = vmatpush.bf16.msra.mxu3 %v304_v6 }
  0x1e   :  { %153 = vmatpush.bf16.msra.mxu0 %v303_v7  ;;  %332 = vmatpush.bf16.msra.mxu1 %v303_v7 }
  0x1f   :  { %333 = vmatpush.bf16.msra.mxu2 %v303_v7  ;;  %334 = vmatpush.bf16.msra.mxu3 %v303_v7 }
  0x21   :  { %154 = vmatmul.bf16.vlgmr.msra.gmra.mxu0 %v295_v8  ;;  %164 = vmatmul.bf16.vlgmr.msra.gmra.mxu1 %v297_v9 }
  0x22   :  { %174 = vmatmul.bf16.vlgmr.msra.gmra.mxu2 %v299_v10  ;;  %184 = vmatmul.bf16.vlgmr.msra.gmra.mxu3 %v301_v11 }
  0x31   :  { %159 = vmatmul.bf16.gmra.mxu0 %v296_v12  ;;  %169 = vmatmul.bf16.gmra.mxu1 %v298_v13 }
  0x32   :  { %179 = vmatmul.bf16.gmra.mxu2 %v300_v14  ;;  %189 = vmatmul.bf16.gmra.mxu3 %v302_v15 }
  0x9e   :  { %v155_v17 = vpop.f32.mrf.mxu0  ;;  %v165_v18 = vpop.f32.mrf.mxu1 }
  0x9f   :  { %v156_v19 = vadd.f32 %v335_v16, %v155_v17  ;;  %v166_v20 = vadd.f32 %v335_v16, %v165_v18 }
  0xa1   :  { %v195_v21 = vmax.f32 %v156_v19, 0.0  ;;  %v199_v22 = vmax.f32 %v166_v20, 0.0 }
  0xa3   :  { %211 = vst [vmem:[%s458_s3] sm:$0xff] %v195_v21 }
  0xa4   :  { %215 = vst [vmem:[%s458_s3 + $0x20] sm:$0xff] %v199_v22 }
  0xa5   :  { %v175_v23 = vpop.f32.mrf.mxu2  ;;  %v185_v24 = vpop.f32.mrf.mxu3 }
  0xa6   :  { %v176_v25 = vadd.f32 %v335_v16, %v175_v23  ;;  %v186_v26 = vadd.f32 %v335_v16, %v185_v24  ;;  %v157_v27 = vpop.f32.mrf.mxu0  ;;  %v167_v28 = vpop.f32.mrf.mxu1 }
  0xa7   :  { %v158_v29 = vadd.f32 %v335_v16, %v157_v27  ;;  %v168_v30 = vadd.f32 %v335_v16, %v167_v28 }
  0xa8   :  { %v203_v31 = vmax.f32 %v176_v25, 0.0  ;;  %v207_v32 = vmax.f32 %v186_v26, 0.0 }
  0xa9   :  { %v196_v33 = vmax.f32 %v158_v29, 0.0  ;;  %v200_v34 = vmax.f32 %v168_v30, 0.0 }
  0xaa   :  { %219 = vst [vmem:[%s458_s3 + $0x40] sm:$0xff] %v203_v31 }
  0xab   :  { %223 = vst [vmem:[%s458_s3 + $0x60] sm:$0xff] %v207_v32 }
  0xac   :  { %212 = vst [vmem:[%s458_s3 + $0x8] sm:$0xff] %v196_v33 }
  0xad   :  { %216 = vst [vmem:[%s458_s3 + $0x28] sm:$0xff] %v200_v34  ;;  %v177_v35 = vpop.f32.mrf.mxu2  ;;  %v187_v36 = vpop.f32.mrf.mxu3 }
  0xae   :  { %v178_v37 = vadd.f32 %v335_v16, %v177_v35  ;;  %v188_v38 = vadd.f32 %v335_v16, %v187_v36  ;;  %v160_v39 = vpop.f32.mrf.mxu0  ;;  %v170_v40 = vpop.f32.mrf.mxu1 }
  0xaf   :  { %v161_v41 = vadd.f32 %v335_v16, %v160_v39  ;;  %v171_v42 = vadd.f32 %v335_v16, %v170_v40 }
  0xb0   :  { %v204_v43 = vmax.f32 %v178_v37, 0.0  ;;  %v208_v44 = vmax.f32 %v188_v38, 0.0 }
  0xb1   :  { %v197_v45 = vmax.f32 %v161_v41, 0.0  ;;  %v201_v46 = vmax.f32 %v171_v42, 0.0 }
  0xb2   :  { %220 = vst [vmem:[%s458_s3 + $0x48] sm:$0xff] %v204_v43 }
  0xb3   :  { %224 = vst [vmem:[%s458_s3 + $0x68] sm:$0xff] %v208_v44 }
  0xb4   :  { %213 = vst [vmem:[%s458_s3 + $0x10] sm:$0xff] %v197_v45 }
  0xb5   :  { %217 = vst [vmem:[%s458_s3 + $0x30] sm:$0xff] %v201_v46  ;;  %v180_v47 = vpop.f32.mrf.mxu2  ;;  %v190_v48 = vpop.f32.mrf.mxu3 }
  0xb6   :  { %v181_v49 = vadd.f32 %v335_v16, %v180_v47  ;;  %v191_v50 = vadd.f32 %v335_v16, %v190_v48  ;;  %v162_v51 = vpop.f32.mrf.mxu0  ;;  %v172_v52 = vpop.f32.mrf.mxu1 }
  0xb7   :  { %v163_v53 = vadd.f32 %v335_v16, %v162_v51  ;;  %v173_v54 = vadd.f32 %v335_v16, %v172_v52 }
  0xb8   :  { %v205_v55 = vmax.f32 %v181_v49, 0.0  ;;  %v209_v56 = vmax.f32 %v191_v50, 0.0 }
  0xb9   :  { %v198_v57 = vmax.f32 %v163_v53, 0.0  ;;  %v202_v58 = vmax.f32 %v173_v54, 0.0 }
  0xba   :  { %221 = vst [vmem:[%s458_s3 + $0x50] sm:$0xff] %v205_v55 }
  0xbb   :  { %225 = vst [vmem:[%s458_s3 + $0x70] sm:$0xff] %v209_v56 }
  0xbc   :  { %214 = vst [vmem:[%s458_s3 + $0x18] sm:$0xff] %v198_v57 }
  0xbd   :  { %218 = vst [vmem:[%s458_s3 + $0x38] sm:$0xff] %v202_v58  ;;  %v182_v59 = vpop.f32.mrf.mxu2  ;;  %v192_v60 = vpop.f32.mrf.mxu3 }
  0xbe   :  { %v183_v61 = vadd.f32 %v335_v16, %v182_v59  ;;  %v193_v62 = vadd.f32 %v335_v16, %v192_v60 }
  0xc0   :  { %v206_v63 = vmax.f32 %v183_v61, 0.0  ;;  %v210_v0 = vmax.f32 %v193_v62, 0.0 }
  0xc2   :  { %222 = vst [vmem:[%s458_s3 + $0x58] sm:$0xff] %v206_v63 }
  0xc3   :  { %226 = vst [vmem:[%s458_s3 + $0x78] sm:$0xff] %v210_v0 }

// kernel: rand_aug_resnet_eval.7
= control target key start
LH: loop header
LB: loop body
LE: loop exit
PB: predicated region body
PF: predicated region fallthrough
CT: control target
= control target key end

     0   :  { %s786_s1 = inlined_call_operand.vmem [shape: bf16[256,128], index: 1, kind: input, shape index: {}]   ;;  %s787_s2 = inlined_call_operand.vmem [shape: f32[1,128], index: 2, kind: input, shape index: {}]   ;;  %s788_s0 = inlined_call_operand.vmem [shape: bf16[128,256], index: 0, kind: input, shape index: {}]   ;;  %s789_s3 = inlined_call_operand.vmem [shape: f32[128,128], index: 3, kind: output, shape index: {}]  }
   0x1   :  { %v527_v0 = vld [vmem:[%s786_s1 + $0x38] sm:$0xff]  ;;  %v526_v2 = vld [vmem:[%s786_s1 + $0x30] sm:$0xff]  ;;  %v525_v4 = vld [vmem:[%s786_s1 + $0x28] sm:$0xff] }
   0x2   :  { %v535_v1 = vld [vmem:[%s786_s1 + $0x78] sm:$0xff]  ;;  %242 = vmatpush.bf16.msra.mxu0 %v527_v0  ;;  %536 = vmatpush.bf16.msra.mxu2 %v527_v0  ;;  %v534_v3 = vld [vmem:[%s786_s1 + $0x70] sm:$0xff]  ;;  %v533_v5 = vld [vmem:[%s786_s1 + $0x68] sm:$0xff] }
   0x3   :  { %291 = vmatpush.bf16.msra.mxu1 %v535_v1  ;;  %544 = vmatpush.bf16.msra.mxu3 %v535_v1  ;;  %v524_v6 = vld [vmem:[%s786_s1 + $0x20] sm:$0xff]  ;;  %v523_v8 = vld [vmem:[%s786_s1 + $0x18] sm:$0xff]  ;;  %v522_v10 = vld [vmem:[%s786_s1 + $0x10] sm:$0xff] }
   0x4   :  { %v532_v7 = vld [vmem:[%s786_s1 + $0x60] sm:$0xff]  ;;  %v531_v9 = vld [vmem:[%s786_s1 + $0x58] sm:$0xff]  ;;  %v530_v11 = vld [vmem:[%s786_s1 + $0x50] sm:$0xff] }
   0x5   :  { %v521_v12 = vld [vmem:[%s786_s1 + $0x8] sm:$0xff]  ;;  %v520_v14 = vld [vmem:[%s786_s1] sm:$0xff]  ;;  %v386_v28 = vld [vmem:[%s788_s0 + $0x10] sm:$0xf] }
   0x6   :  { %243 = vmatpush.bf16.msra.mxu0 %v526_v2  ;;  %537 = vmatpush.bf16.msra.mxu2 %v526_v2  ;;  %v529_v13 = vld [vmem:[%s786_s1 + $0x48] sm:$0xff]  ;;  %v528_v15 = vld [vmem:[%s786_s1 + $0x40] sm:$0xff]  ;;  %v507_v29 = vld [vmem:[%s788_s0 + $0x14] sm:$0xf0] }
   0x7   :  { %292 = vmatpush.bf16.msra.mxu1 %v534_v3  ;;  %545 = vmatpush.bf16.msra.mxu3 %v534_v3  ;;  %v378_v16 = vld [vmem:[%s788_s0] sm:$0xf]  ;;  %v505_v17 = vld [vmem:[%s788_s0 + $0x4] sm:$0xf0]  ;;  %v504_v20 = vld [vmem:[%s788_s0 + $0x4] sm:$0xf]  ;;  %v387_v36 = vor.u32 %v507_v29, %v386_v28 }
   0x8   :  { %v410_v18 = vld [vmem:[%s788_s0 + $0x40] sm:$0xf]  ;;  %v513_v19 = vld [vmem:[%s788_s0 + $0x44] sm:$0xf0]  ;;  %v380_v21 = vld [vmem:[%s788_s0 + $0x8] sm:$0xf0]  ;;  %v379_v24 = vor.u32 %v505_v17, %v378_v16 }
   0x9   :  { %v512_v22 = vld [vmem:[%s788_s0 + $0x44] sm:$0xf]  ;;  %v412_v23 = vld [vmem:[%s788_s0 + $0x48] sm:$0xf0]  ;;  %v411_v25 = vor.u32 %v513_v19, %v410_v18  ;;  %v383_v26 = vor.u32 %v504_v20, %v380_v21  ;;  %v418_v30 = vld [vmem:[%s788_s0 + $0x50] sm:$0xf] }
   0xa   :  { %244 = vmatpush.bf16.msra.mxu0 %v525_v4  ;;  %538 = vmatpush.bf16.msra.mxu2 %v525_v4  ;;  %v415_v27 = vor.u32 %v512_v22, %v412_v23  ;;  %v515_v31 = vld [vmem:[%s788_s0 + $0x54] sm:$0xf0]  ;;  %v506_v32 = vld [vmem:[%s788_s0 + $0x14] sm:$0xf]  ;;  %v388_v33 = vld [vmem:[%s788_s0 + $0x18] sm:$0xf0] }
   0xb   :  { %293 = vmatpush.bf16.msra.mxu1 %v533_v5  ;;  %546 = vmatpush.bf16.msra.mxu3 %v533_v5  ;;  %v514_v34 = vld [vmem:[%s788_s0 + $0x54] sm:$0xf]  ;;  %v420_v35 = vld [vmem:[%s788_s0 + $0x58] sm:$0xf0]  ;;  %v419_v37 = vor.u32 %v515_v31, %v418_v30  ;;  %v391_v38 = vor.u32 %v506_v32, %v388_v33  ;;  %v394_v40 = vld [vmem:[%s788_s0 + $0x20] sm:$0xf] }
   0xc   :  { %v423_v39 = vor.u32 %v514_v34, %v420_v35  ;;  %v509_v41 = vld [vmem:[%s788_s0 + $0x24] sm:$0xf0]  ;;  %v426_v42 = vld [vmem:[%s788_s0 + $0x60] sm:$0xf]  ;;  %v508_v44 = vld [vmem:[%s788_s0 + $0x24] sm:$0xf] }
   0xd   :  { %v517_v43 = vld [vmem:[%s788_s0 + $0x64] sm:$0xf0]  ;;  %v396_v45 = vld [vmem:[%s788_s0 + $0x28] sm:$0xf0]  ;;  %v516_v46 = vld [vmem:[%s788_s0 + $0x64] sm:$0xf]  ;;  %v395_v48 = vor.u32 %v509_v41, %v394_v40 }
   0xe   :  { %245 = vmatpush.bf16.msra.mxu0 %v524_v6  ;;  %539 = vmatpush.bf16.msra.mxu2 %v524_v6  ;;  %v428_v47 = vld [vmem:[%s788_s0 + $0x68] sm:$0xf0]  ;;  %v427_v49 = vor.u32 %v517_v43, %v426_v42  ;;  %v399_v50 = vor.u32 %v508_v44, %v396_v45  ;;  %v402_v52 = vld [vmem:[%s788_s0 + $0x30] sm:$0xf]  ;;  %v511_v53 = vld [vmem:[%s788_s0 + $0x34] sm:$0xf0] }
   0xf   :  { %294 = vmatpush.bf16.msra.mxu1 %v532_v7  ;;  %547 = vmatpush.bf16.msra.mxu3 %v532_v7  ;;  %v431_v51 = vor.u32 %v516_v46, %v428_v47  ;;  %v434_v54 = vld [vmem:[%s788_s0 + $0x70] sm:$0xf]  ;;  %v519_v55 = vld [vmem:[%s788_s0 + $0x74] sm:$0xf0]  ;;  %v510_v56 = vld [vmem:[%s788_s0 + $0x34] sm:$0xf]  ;;  %v403_v60 = vor.u32 %v511_v53, %v402_v52 }
  0x10   :  { %v404_v57 = vld [vmem:[%s788_s0 + $0x38] sm:$0xf0]  ;;  %v518_v58 = vld [vmem:[%s788_s0 + $0x74] sm:$0xf]  ;;  %v435_v61 = vor.u32 %v519_v55, %v434_v54  ;;  %v720_v0 = vld [vmem:[%s787_s2] ss:$0 sm:$0xff] }
  0x11   :  { %v436_v59 = vld [vmem:[%s788_s0 + $0x78] sm:$0xf0]  ;;  %v407_v62 = vor.u32 %v510_v56, %v404_v57 }
  0x12   :  { %246 = vmatpush.bf16.msra.mxu0 %v523_v8  ;;  %540 = vmatpush.bf16.msra.mxu2 %v523_v8  ;;  %v439_v63 = vor.u32 %v518_v58, %v436_v59 }
  0x13   :  { %295 = vmatpush.bf16.msra.mxu1 %v531_v9  ;;  %548 = vmatpush.bf16.msra.mxu3 %v531_v9 }
  0x16   :  { %247 = vmatpush.bf16.msra.mxu0 %v522_v10  ;;  %541 = vmatpush.bf16.msra.mxu2 %v522_v10 }
  0x17   :  { %296 = vmatpush.bf16.msra.mxu1 %v530_v11  ;;  %549 = vmatpush.bf16.msra.mxu3 %v530_v11 }
  0x1a   :  { %248 = vmatpush.bf16.msra.mxu0 %v521_v12  ;;  %542 = vmatpush.bf16.msra.mxu2 %v521_v12 }
  0x1b   :  { %297 = vmatpush.bf16.msra.mxu1 %v529_v13  ;;  %550 = vmatpush.bf16.msra.mxu3 %v529_v13 }
  0x1e   :  { %249 = vmatpush.bf16.msra.mxu0 %v520_v14  ;;  %543 = vmatpush.bf16.msra.mxu2 %v520_v14 }
  0x1f   :  { %298 = vmatpush.bf16.msra.mxu1 %v528_v15  ;;  %551 = vmatpush.bf16.msra.mxu3 %v528_v15 }
  0x21   :  { %250 = vmatmul.bf16.vlgmr.msra.gmra.mxu0 %v379_v24  ;;  %270 = vmatmul.bf16.vlgmr.msra.gmra.mxu2 %v411_v25 }
  0x22   :  { %299 = vmatmul.bf16.vlgmr.msra.gmra.mxu1 %v383_v26  ;;  %319 = vmatmul.bf16.vlgmr.msra.gmra.mxu3 %v415_v27 }
  0x31   :  { %255 = vmatmul.bf16.gmra.mxu0 %v387_v36  ;;  %275 = vmatmul.bf16.gmra.mxu2 %v419_v37 }
  0x32   :  { %304 = vmatmul.bf16.gmra.mxu1 %v391_v38  ;;  %324 = vmatmul.bf16.gmra.mxu3 %v423_v39 }
  0x41   :  { %260 = vmatmul.bf16.gmra.mxu0 %v395_v48  ;;  %280 = vmatmul.bf16.gmra.mxu2 %v427_v49 }
  0x42   :  { %309 = vmatmul.bf16.gmra.mxu1 %v399_v50  ;;  %329 = vmatmul.bf16.gmra.mxu3 %v431_v51 }
  0x51   :  { %265 = vmatmul.bf16.gmra.mxu0 %v403_v60  ;;  %285 = vmatmul.bf16.gmra.mxu2 %v435_v61 }
  0x52   :  { %314 = vmatmul.bf16.gmra.mxu1 %v407_v62  ;;  %334 = vmatmul.bf16.gmra.mxu3 %v439_v63 }
  0x9e   :  { %v251_v1 = vpop.f32.mrf.mxu0 }
  0x9f   :  { %v252_v2 = vadd.f32 %v720_v0, %v251_v1  ;;  %v300_v3 = vpop.f32.mrf.mxu1 }
  0xa1   :  { %v301_v4 = vadd.f32 %v300_v3, %v252_v2 }
  0xa3   :  { %v340_v5 = vmax.f32 %v301_v4, 0.0 }
  0xa4   :  { %v271_v6 = vpop.f32.mrf.mxu2 }
  0xa5   :  { %356 = vst [vmem:[%s789_s3] sm:$0xff] %v340_v5  ;;  %v272_v7 = vadd.f32 %v720_v0, %v271_v6  ;;  %v320_v8 = vpop.f32.mrf.mxu3 }
  0xa6   :  { %v253_v9 = vpop.f32.mrf.mxu0 }
  0xa7   :  { %v321_v10 = vadd.f32 %v320_v8, %v272_v7  ;;  %v254_v11 = vadd.f32 %v720_v0, %v253_v9  ;;  %v302_v12 = vpop.f32.mrf.mxu1 }
  0xa9   :  { %v348_v13 = vmax.f32 %v321_v10, 0.0  ;;  %v303_v14 = vadd.f32 %v302_v12, %v254_v11 }
  0xab   :  { %364 = vst [vmem:[%s789_s3 + $0x40] sm:$0xff] %v348_v13  ;;  %v341_v15 = vmax.f32 %v303_v14, 0.0 }
  0xac   :  { %v273_v16 = vpop.f32.mrf.mxu2 }
  0xad   :  { %357 = vst [vmem:[%s789_s3 + $0x8] sm:$0xff] %v341_v15  ;;  %v274_v17 = vadd.f32 %v720_v0, %v273_v16  ;;  %v322_v18 = vpop.f32.mrf.mxu3 }
  0xae   :  { %v256_v19 = vpop.f32.mrf.mxu0 }
  0xaf   :  { %v323_v20 = vadd.f32 %v322_v18, %v274_v17  ;;  %v257_v21 = vadd.f32 %v720_v0, %v256_v19  ;;  %v305_v22 = vpop.f32.mrf.mxu1 }
  0xb1   :  { %v349_v23 = vmax.f32 %v323_v20, 0.0  ;;  %v306_v24 = vadd.f32 %v305_v22, %v257_v21 }
  0xb3   :  { %365 = vst [vmem:[%s789_s3 + $0x48] sm:$0xff] %v349_v23  ;;  %v342_v25 = vmax.f32 %v306_v24, 0.0 }
  0xb4   :  { %v276_v26 = vpop.f32.mrf.mxu2 }
  0xb5   :  { %358 = vst [vmem:[%s789_s3 + $0x10] sm:$0xff] %v342_v25  ;;  %v277_v27 = vadd.f32 %v720_v0, %v276_v26  ;;  %v325_v28 = vpop.f32.mrf.mxu3 }
  0xb6   :  { %v258_v29 = vpop.f32.mrf.mxu0 }
  0xb7   :  { %v326_v30 = vadd.f32 %v325_v28, %v277_v27  ;;  %v259_v31 = vadd.f32 %v720_v0, %v258_v29  ;;  %v307_v32 = vpop.f32.mrf.mxu1 }
  0xb9   :  { %v350_v33 = vmax.f32 %v326_v30, 0.0  ;;  %v308_v34 = vadd.f32 %v307_v32, %v259_v31 }
  0xbb   :  { %366 = vst [vmem:[%s789_s3 + $0x50] sm:$0xff] %v350_v33  ;;  %v343_v35 = vmax.f32 %v308_v34, 0.0 }
  0xbc   :  { %v278_v36 = vpop.f32.mrf.mxu2 }
  0xbd   :  { %359 = vst [vmem:[%s789_s3 + $0x18] sm:$0xff] %v343_v35  ;;  %v279_v37 = vadd.f32 %v720_v0, %v278_v36  ;;  %v327_v38 = vpop.f32.mrf.mxu3 }
  0xbe   :  { %v261_v39 = vpop.f32.mrf.mxu0 }
  0xbf   :  { %v328_v40 = vadd.f32 %v327_v38, %v279_v37  ;;  %v262_v41 = vadd.f32 %v720_v0, %v261_v39  ;;  %v310_v42 = vpop.f32.mrf.mxu1 }
  0xc1   :  { %v351_v43 = vmax.f32 %v328_v40, 0.0  ;;  %v311_v44 = vadd.f32 %v310_v42, %v262_v41 }
  0xc3   :  { %367 = vst [vmem:[%s789_s3 + $0x58] sm:$0xff] %v351_v43  ;;  %v344_v45 = vmax.f32 %v311_v44, 0.0 }
  0xc4   :  { %v281_v46 = vpop.f32.mrf.mxu2 }
  0xc5   :  { %360 = vst [vmem:[%s789_s3 + $0x20] sm:$0xff] %v344_v45  ;;  %v282_v47 = vadd.f32 %v720_v0, %v281_v46  ;;  %v330_v48 = vpop.f32.mrf.mxu3 }
  0xc6   :  { %v263_v49 = vpop.f32.mrf.mxu0 }
  0xc7   :  { %v331_v50 = vadd.f32 %v330_v48, %v282_v47  ;;  %v264_v51 = vadd.f32 %v720_v0, %v263_v49  ;;  %v312_v52 = vpop.f32.mrf.mxu1 }
  0xc9   :  { %v352_v53 = vmax.f32 %v331_v50, 0.0  ;;  %v313_v54 = vadd.f32 %v312_v52, %v264_v51 }
  0xcb   :  { %368 = vst [vmem:[%s789_s3 + $0x60] sm:$0xff] %v352_v53  ;;  %v345_v55 = vmax.f32 %v313_v54, 0.0 }
  0xcc   :  { %v283_v56 = vpop.f32.mrf.mxu2 }
  0xcd   :  { %361 = vst [vmem:[%s789_s3 + $0x28] sm:$0xff] %v345_v55  ;;  %v284_v57 = vadd.f32 %v720_v0, %v283_v56  ;;  %v332_v58 = vpop.f32.mrf.mxu3 }
  0xce   :  { %v266_v59 = vpop.f32.mrf.mxu0 }
  0xcf   :  { %v333_v60 = vadd.f32 %v332_v58, %v284_v57  ;;  %v267_v61 = vadd.f32 %v720_v0, %v266_v59  ;;  %v315_v62 = vpop.f32.mrf.mxu1 }
  0xd1   :  { %v353_v63 = vmax.f32 %v333_v60, 0.0  ;;  %v316_v1 = vadd.f32 %v315_v62, %v267_v61 }
  0xd3   :  { %369 = vst [vmem:[%s789_s3 + $0x68] sm:$0xff] %v353_v63  ;;  %v346_v2 = vmax.f32 %v316_v1, 0.0 }
  0xd4   :  { %v286_v3 = vpop.f32.mrf.mxu2 }
  0xd5   :  { %362 = vst [vmem:[%s789_s3 + $0x30] sm:$0xff] %v346_v2  ;;  %v287_v4 = vadd.f32 %v720_v0, %v286_v3  ;;  %v335_v5 = vpop.f32.mrf.mxu3 }
  0xd6   :  { %v268_v6 = vpop.f32.mrf.mxu0 }
  0xd7   :  { %v336_v7 = vadd.f32 %v335_v5, %v287_v4  ;;  %v269_v8 = vadd.f32 %v720_v0, %v268_v6  ;;  %v317_v9 = vpop.f32.mrf.mxu1 }
  0xd9   :  { %v354_v10 = vmax.f32 %v336_v7, 0.0  ;;  %v318_v11 = vadd.f32 %v317_v9, %v269_v8 }
  0xdb   :  { %370 = vst [vmem:[%s789_s3 + $0x70] sm:$0xff] %v354_v10  ;;  %v347_v12 = vmax.f32 %v318_v11, 0.0 }
  0xdc   :  { %v288_v13 = vpop.f32.mrf.mxu2 }
  0xdd   :  { %363 = vst [vmem:[%s789_s3 + $0x38] sm:$0xff] %v347_v12  ;;  %v289_v14 = vadd.f32 %v720_v0, %v288_v13  ;;  %v337_v15 = vpop.f32.mrf.mxu3 }
  0xdf   :  { %v338_v16 = vadd.f32 %v337_v15, %v289_v14 }
  0xe1   :  { %v355_v17 = vmax.f32 %v338_v16, 0.0 }
  0xe3   :  { %371 = vst [vmem:[%s789_s3 + $0x78] sm:$0xff] %v355_v17 }

// kernel: rand_aug_resnet_eval.8
= control target key start
LH: loop header
LB: loop body
LE: loop exit
PB: predicated region body
PF: predicated region fallthrough
CT: control target
= control target key end

     0   :  { %s874_s1 = inlined_call_operand.vmem [shape: bf16[256,128], index: 1, kind: input, shape index: {}]   ;;  %s875_s2 = inlined_call_operand.vmem [shape: f32[1,128], index: 2, kind: input, shape index: {}]   ;;  %s876_s0 = inlined_call_operand.vmem [shape: bf16[128,256], index: 0, kind: input, shape index: {}]   ;;  %s877_s3 = inlined_call_operand.vmem [shape: f32[128,128], index: 3, kind: input, shape index: {}]   ;;  %s878_s4 = inlined_call_operand.vmem [shape: f32[128,128], index: 4, kind: output, shape index: {}]  }
   0x1   :  { %v562_v0 = vld [vmem:[%s874_s1 + $0x38] sm:$0xff]  ;;  %v561_v2 = vld [vmem:[%s874_s1 + $0x30] sm:$0xff]  ;;  %v560_v4 = vld [vmem:[%s874_s1 + $0x28] sm:$0xff] }
   0x2   :  { %v570_v1 = vld [vmem:[%s874_s1 + $0x78] sm:$0xff]  ;;  %245 = vmatpush.bf16.msra.mxu0 %v562_v0  ;;  %571 = vmatpush.bf16.msra.mxu2 %v562_v0  ;;  %v569_v3 = vld [vmem:[%s874_s1 + $0x70] sm:$0xff]  ;;  %v568_v5 = vld [vmem:[%s874_s1 + $0x68] sm:$0xff] }
   0x3   :  { %294 = vmatpush.bf16.msra.mxu1 %v570_v1  ;;  %579 = vmatpush.bf16.msra.mxu3 %v570_v1  ;;  %v559_v6 = vld [vmem:[%s874_s1 + $0x20] sm:$0xff]  ;;  %v558_v8 = vld [vmem:[%s874_s1 + $0x18] sm:$0xff]  ;;  %v557_v10 = vld [vmem:[%s874_s1 + $0x10] sm:$0xff] }
   0x4   :  { %v567_v7 = vld [vmem:[%s874_s1 + $0x60] sm:$0xff]  ;;  %v566_v9 = vld [vmem:[%s874_s1 + $0x58] sm:$0xff]  ;;  %v565_v11 = vld [vmem:[%s874_s1 + $0x50] sm:$0xff] }
   0x5   :  { %v556_v12 = vld [vmem:[%s874_s1 + $0x8] sm:$0xff]  ;;  %v555_v14 = vld [vmem:[%s874_s1] sm:$0xff]  ;;  %v421_v28 = vld [vmem:[%s876_s0 + $0x10] sm:$0xf] }
   0x6   :  { %246 = vmatpush.bf16.msra.mxu0 %v561_v2  ;;  %572 = vmatpush.bf16.msra.mxu2 %v561_v2  ;;  %v564_v13 = vld [vmem:[%s874_s1 + $0x48] sm:$0xff]  ;;  %v563_v15 = vld [vmem:[%s874_s1 + $0x40] sm:$0xff]  ;;  %v542_v29 = vld [vmem:[%s876_s0 + $0x14] sm:$0xf0] }
   0x7   :  { %295 = vmatpush.bf16.msra.mxu1 %v569_v3  ;;  %580 = vmatpush.bf16.msra.mxu3 %v569_v3  ;;  %v413_v16 = vld [vmem:[%s876_s0] sm:$0xf]  ;;  %v540_v17 = vld [vmem:[%s876_s0 + $0x4] sm:$0xf0]  ;;  %v539_v20 = vld [vmem:[%s876_s0 + $0x4] sm:$0xf]  ;;  %v422_v36 = vor.u32 %v542_v29, %v421_v28 }
   0x8   :  { %v445_v18 = vld [vmem:[%s876_s0 + $0x40] sm:$0xf]  ;;  %v548_v19 = vld [vmem:[%s876_s0 + $0x44] sm:$0xf0]  ;;  %v415_v21 = vld [vmem:[%s876_s0 + $0x8] sm:$0xf0]  ;;  %v414_v24 = vor.u32 %v540_v17, %v413_v16 }
   0x9   :  { %v547_v22 = vld [vmem:[%s876_s0 + $0x44] sm:$0xf]  ;;  %v447_v23 = vld [vmem:[%s876_s0 + $0x48] sm:$0xf0]  ;;  %v446_v25 = vor.u32 %v548_v19, %v445_v18  ;;  %v418_v26 = vor.u32 %v539_v20, %v415_v21  ;;  %v453_v30 = vld [vmem:[%s876_s0 + $0x50] sm:$0xf] }
   0xa   :  { %247 = vmatpush.bf16.msra.mxu0 %v560_v4  ;;  %573 = vmatpush.bf16.msra.mxu2 %v560_v4  ;;  %v450_v27 = vor.u32 %v547_v22, %v447_v23  ;;  %v550_v31 = vld [vmem:[%s876_s0 + $0x54] sm:$0xf0]  ;;  %v541_v32 = vld [vmem:[%s876_s0 + $0x14] sm:$0xf]  ;;  %v423_v33 = vld [vmem:[%s876_s0 + $0x18] sm:$0xf0] }
   0xb   :  { %296 = vmatpush.bf16.msra.mxu1 %v568_v5  ;;  %581 = vmatpush.bf16.msra.mxu3 %v568_v5  ;;  %v549_v34 = vld [vmem:[%s876_s0 + $0x54] sm:$0xf]  ;;  %v455_v35 = vld [vmem:[%s876_s0 + $0x58] sm:$0xf0]  ;;  %v454_v37 = vor.u32 %v550_v31, %v453_v30  ;;  %v426_v38 = vor.u32 %v541_v32, %v423_v33  ;;  %v429_v40 = vld [vmem:[%s876_s0 + $0x20] sm:$0xf] }
   0xc   :  { %v458_v39 = vor.u32 %v549_v34, %v455_v35  ;;  %v544_v41 = vld [vmem:[%s876_s0 + $0x24] sm:$0xf0]  ;;  %v461_v42 = vld [vmem:[%s876_s0 + $0x60] sm:$0xf]  ;;  %v543_v44 = vld [vmem:[%s876_s0 + $0x24] sm:$0xf] }
   0xd   :  { %v552_v43 = vld [vmem:[%s876_s0 + $0x64] sm:$0xf0]  ;;  %v431_v45 = vld [vmem:[%s876_s0 + $0x28] sm:$0xf0]  ;;  %v551_v46 = vld [vmem:[%s876_s0 + $0x64] sm:$0xf]  ;;  %v430_v48 = vor.u32 %v544_v41, %v429_v40 }
   0xe   :  { %248 = vmatpush.bf16.msra.mxu0 %v559_v6  ;;  %574 = vmatpush.bf16.msra.mxu2 %v559_v6  ;;  %v463_v47 = vld [vmem:[%s876_s0 + $0x68] sm:$0xf0]  ;;  %v462_v49 = vor.u32 %v552_v43, %v461_v42  ;;  %v434_v50 = vor.u32 %v543_v44, %v431_v45  ;;  %v437_v52 = vld [vmem:[%s876_s0 + $0x30] sm:$0xf]  ;;  %v546_v53 = vld [vmem:[%s876_s0 + $0x34] sm:$0xf0] }
   0xf   :  { %297 = vmatpush.bf16.msra.mxu1 %v567_v7  ;;  %582 = vmatpush.bf16.msra.mxu3 %v567_v7  ;;  %v466_v51 = vor.u32 %v551_v46, %v463_v47  ;;  %v469_v54 = vld [vmem:[%s876_s0 + $0x70] sm:$0xf]  ;;  %v554_v55 = vld [vmem:[%s876_s0 + $0x74] sm:$0xf0]  ;;  %v545_v56 = vld [vmem:[%s876_s0 + $0x34] sm:$0xf]  ;;  %v438_v60 = vor.u32 %v546_v53, %v437_v52 }
  0x10   :  { %v439_v57 = vld [vmem:[%s876_s0 + $0x38] sm:$0xf0]  ;;  %v553_v58 = vld [vmem:[%s876_s0 + $0x74] sm:$0xf]  ;;  %v470_v61 = vor.u32 %v554_v55, %v469_v54  ;;  %v760_v0 = vld [vmem:[%s875_s2] ss:$0 sm:$0xff] }
  0x11   :  { %v471_v59 = vld [vmem:[%s876_s0 + $0x78] sm:$0xf0]  ;;  %v442_v62 = vor.u32 %v545_v56, %v439_v57  ;;  %v343_v4 = vld [vmem:[%s877_s3] sm:$0xff]  ;;  %v344_v16 = vld [vmem:[%s877_s3 + $0x8] sm:$0xff] }
  0x12   :  { %249 = vmatpush.bf16.msra.mxu0 %v558_v8  ;;  %575 = vmatpush.bf16.msra.mxu2 %v558_v8  ;;  %v474_v63 = vor.u32 %v553_v58, %v471_v59  ;;  %v345_v30 = vld [vmem:[%s877_s3 + $0x10] sm:$0xff]  ;;  %v346_v44 = vld [vmem:[%s877_s3 + $0x18] sm:$0xff]  ;;  %v347_v58 = vld [vmem:[%s877_s3 + $0x20] sm:$0xff] }
  0x13   :  { %298 = vmatpush.bf16.msra.mxu1 %v566_v9  ;;  %583 = vmatpush.bf16.msra.mxu3 %v566_v9  ;;  %v354_v53 = vld [vmem:[%s877_s3 + $0x58] sm:$0xff] }
  0x16   :  { %250 = vmatpush.bf16.msra.mxu0 %v557_v10  ;;  %576 = vmatpush.bf16.msra.mxu2 %v557_v10 }
  0x17   :  { %299 = vmatpush.bf16.msra.mxu1 %v565_v11  ;;  %584 = vmatpush.bf16.msra.mxu3 %v565_v11  ;;  %v351_v11 = vld [vmem:[%s877_s3 + $0x40] sm:$0xff] }
  0x1a   :  { %251 = vmatpush.bf16.msra.mxu0 %v556_v12  ;;  %577 = vmatpush.bf16.msra.mxu2 %v556_v12 }
  0x1b   :  { %300 = vmatpush.bf16.msra.mxu1 %v564_v13  ;;  %585 = vmatpush.bf16.msra.mxu3 %v564_v13 }
  0x1e   :  { %252 = vmatpush.bf16.msra.mxu0 %v555_v14  ;;  %578 = vmatpush.bf16.msra.mxu2 %v555_v14 }
  0x1f   :  { %301 = vmatpush.bf16.msra.mxu1 %v563_v15  ;;  %586 = vmatpush.bf16.msra.mxu3 %v563_v15 }
  0x21   :  { %253 = vmatmul.bf16.vlgmr.msra.gmra.mxu0 %v414_v24  ;;  %273 = vmatmul.bf16.vlgmr.msra.gmra.mxu2 %v446_v25  ;;  %v352_v25 = vld [vmem:[%s877_s3 + $0x48] sm:$0xff] }
  0x22   :  { %302 = vmatmul.bf16.vlgmr.msra.gmra.mxu1 %v418_v26  ;;  %322 = vmatmul.bf16.vlgmr.msra.gmra.mxu3 %v450_v27 }
  0x31   :  { %258 = vmatmul.bf16.gmra.mxu0 %v422_v36  ;;  %278 = vmatmul.bf16.gmra.mxu2 %v454_v37 }
  0x32   :  { %307 = vmatmul.bf16.gmra.mxu1 %v426_v38  ;;  %327 = vmatmul.bf16.gmra.mxu3 %v458_v39  ;;  %v353_v39 = vld [vmem:[%s877_s3 + $0x50] sm:$0xff] }
  0x41   :  { %263 = vmatmul.bf16.gmra.mxu0 %v430_v48  ;;  %283 = vmatmul.bf16.gmra.mxu2 %v462_v49 }
  0x42   :  { %312 = vmatmul.bf16.gmra.mxu1 %v434_v50  ;;  %332 = vmatmul.bf16.gmra.mxu3 %v466_v51 }
  0x51   :  { %268 = vmatmul.bf16.gmra.mxu0 %v438_v60  ;;  %288 = vmatmul.bf16.gmra.mxu2 %v470_v61 }
  0x52   :  { %317 = vmatmul.bf16.gmra.mxu1 %v442_v62  ;;  %337 = vmatmul.bf16.gmra.mxu3 %v474_v63 }
  0x9e   :  { %v254_v1 = vpop.f32.mrf.mxu0 }
  0x9f   :  { %v255_v2 = vadd.f32 %v760_v0, %v254_v1  ;;  %v303_v3 = vpop.f32.mrf.mxu1 }
  0xa1   :  { %v304_v5 = vadd.f32 %v303_v3, %v255_v2 }
  0xa3   :  { %v359_v6 = vadd.f32 %v343_v4, %v304_v5  ;;  %v355_v4 = vld [vmem:[%s877_s3 + $0x60] sm:$0xff] }
  0xa4   :  { %v274_v7 = vpop.f32.mrf.mxu2 }
  0xa5   :  { %v375_v8 = vmax.f32 %v359_v6, 0.0  ;;  %v275_v9 = vadd.f32 %v760_v0, %v274_v7  ;;  %v323_v10 = vpop.f32.mrf.mxu3 }
  0xa6   :  { %v256_v12 = vpop.f32.mrf.mxu0 }
  0xa7   :  { %391 = vst [vmem:[%s878_s4] sm:$0xff] %v375_v8  ;;  %v324_v13 = vadd.f32 %v323_v10, %v275_v9  ;;  %v257_v14 = vadd.f32 %v760_v0, %v256_v12  ;;  %v305_v15 = vpop.f32.mrf.mxu1  ;;  %v348_v9 = vld [vmem:[%s877_s3 + $0x28] sm:$0xff] }
  0xa9   :  { %v367_v17 = vadd.f32 %v351_v11, %v324_v13  ;;  %v306_v18 = vadd.f32 %v305_v15, %v257_v14 }
  0xab   :  { %v383_v19 = vmax.f32 %v367_v17, 0.0  ;;  %v360_v20 = vadd.f32 %v344_v16, %v306_v18  ;;  %v356_v18 = vld [vmem:[%s877_s3 + $0x68] sm:$0xff] }
  0xac   :  { %v276_v21 = vpop.f32.mrf.mxu2 }
  0xad   :  { %399 = vst [vmem:[%s878_s4 + $0x40] sm:$0xff] %v383_v19  ;;  %v376_v22 = vmax.f32 %v360_v20, 0.0  ;;  %v277_v23 = vadd.f32 %v760_v0, %v276_v21  ;;  %v325_v24 = vpop.f32.mrf.mxu3 }
  0xae   :  { %v259_v26 = vpop.f32.mrf.mxu0 }
  0xaf   :  { %392 = vst [vmem:[%s878_s4 + $0x8] sm:$0xff] %v376_v22  ;;  %v326_v27 = vadd.f32 %v325_v24, %v277_v23  ;;  %v260_v28 = vadd.f32 %v760_v0, %v259_v26  ;;  %v308_v29 = vpop.f32.mrf.mxu1  ;;  %v349_v23 = vld [vmem:[%s877_s3 + $0x30] sm:$0xff] }
  0xb1   :  { %v368_v31 = vadd.f32 %v352_v25, %v326_v27  ;;  %v309_v32 = vadd.f32 %v308_v29, %v260_v28 }
  0xb3   :  { %v384_v33 = vmax.f32 %v368_v31, 0.0  ;;  %v361_v34 = vadd.f32 %v345_v30, %v309_v32  ;;  %v357_v32 = vld [vmem:[%s877_s3 + $0x70] sm:$0xff] }
  0xb4   :  { %v279_v35 = vpop.f32.mrf.mxu2 }
  0xb5   :  { %400 = vst [vmem:[%s878_s4 + $0x48] sm:$0xff] %v384_v33  ;;  %v377_v36 = vmax.f32 %v361_v34, 0.0  ;;  %v280_v37 = vadd.f32 %v760_v0, %v279_v35  ;;  %v328_v38 = vpop.f32.mrf.mxu3 }
  0xb6   :  { %v261_v40 = vpop.f32.mrf.mxu0 }
  0xb7   :  { %393 = vst [vmem:[%s878_s4 + $0x10] sm:$0xff] %v377_v36  ;;  %v329_v41 = vadd.f32 %v328_v38, %v280_v37  ;;  %v262_v42 = vadd.f32 %v760_v0, %v261_v40  ;;  %v310_v43 = vpop.f32.mrf.mxu1  ;;  %v350_v37 = vld [vmem:[%s877_s3 + $0x38] sm:$0xff] }
  0xb9   :  { %v369_v45 = vadd.f32 %v353_v39, %v329_v41  ;;  %v311_v46 = vadd.f32 %v310_v43, %v262_v42 }
  0xbb   :  { %v385_v47 = vmax.f32 %v369_v45, 0.0  ;;  %v362_v48 = vadd.f32 %v346_v44, %v311_v46  ;;  %v358_v46 = vld [vmem:[%s877_s3 + $0x78] sm:$0xff] }
  0xbc   :  { %v281_v49 = vpop.f32.mrf.mxu2 }
  0xbd   :  { %401 = vst [vmem:[%s878_s4 + $0x50] sm:$0xff] %v385_v47  ;;  %v378_v50 = vmax.f32 %v362_v48, 0.0  ;;  %v282_v51 = vadd.f32 %v760_v0, %v281_v49  ;;  %v330_v52 = vpop.f32.mrf.mxu3 }
  0xbe   :  { %v264_v54 = vpop.f32.mrf.mxu0 }
  0xbf   :  { %394 = vst [vmem:[%s878_s4 + $0x18] sm:$0xff] %v378_v50  ;;  %v331_v55 = vadd.f32 %v330_v52, %v282_v51  ;;  %v265_v56 = vadd.f32 %v760_v0, %v264_v54  ;;  %v313_v57 = vpop.f32.mrf.mxu1 }
  0xc1   :  { %v370_v59 = vadd.f32 %v354_v53, %v331_v55  ;;  %v314_v60 = vadd.f32 %v313_v57, %v265_v56 }
  0xc3   :  { %v386_v61 = vmax.f32 %v370_v59, 0.0  ;;  %v363_v62 = vadd.f32 %v347_v58, %v314_v60 }
  0xc4   :  { %v284_v63 = vpop.f32.mrf.mxu2 }
  0xc5   :  { %402 = vst [vmem:[%s878_s4 + $0x58] sm:$0xff] %v386_v61  ;;  %v379_v1 = vmax.f32 %v363_v62, 0.0  ;;  %v285_v2 = vadd.f32 %v760_v0, %v284_v63  ;;  %v333_v3 = vpop.f32.mrf.mxu3 }
  0xc6   :  { %v266_v5 = vpop.f32.mrf.mxu0 }
  0xc7   :  { %395 = vst [vmem:[%s878_s4 + $0x20] sm:$0xff] %v379_v1  ;;  %v334_v6 = vadd.f32 %v333_v3, %v285_v2  ;;  %v267_v7 = vadd.f32 %v760_v0, %v266_v5  ;;  %v315_v8 = vpop.f32.mrf.mxu1 }
  0xc9   :  { %v371_v10 = vadd.f32 %v355_v4, %v334_v6  ;;  %v316_v11 = vadd.f32 %v315_v8, %v267_v7 }
  0xcb   :  { %v387_v12 = vmax.f32 %v371_v10, 0.0  ;;  %v364_v13 = vadd.f32 %v348_v9, %v316_v11 }
  0xcc   :  { %v286_v14 = vpop.f32.mrf.mxu2 }
  0xcd   :  { %403 = vst [vmem:[%s878_s4 + $0x60] sm:$0xff] %v387_v12  ;;  %v380_v15 = vmax.f32 %v364_v13, 0.0  ;;  %v287_v16 = vadd.f32 %v760_v0, %v286_v14  ;;  %v335_v17 = vpop.f32.mrf.mxu3 }
  0xce   :  { %v269_v19 = vpop.f32.mrf.mxu0 }
  0xcf   :  { %396 = vst [vmem:[%s878_s4 + $0x28] sm:$0xff] %v380_v15  ;;  %v336_v20 = vadd.f32 %v335_v17, %v287_v16  ;;  %v270_v21 = vadd.f32 %v760_v0, %v269_v19  ;;  %v318_v22 = vpop.f32.mrf.mxu1 }
  0xd1   :  { %v372_v24 = vadd.f32 %v356_v18, %v336_v20  ;;  %v319_v25 = vadd.f32 %v318_v22, %v270_v21 }
  0xd3   :  { %v388_v26 = vmax.f32 %v372_v24, 0.0  ;;  %v365_v27 = vadd.f32 %v349_v23, %v319_v25 }
  0xd4   :  { %v289_v28 = vpop.f32.mrf.mxu2 }
  0xd5   :  { %404 = vst [vmem:[%s878_s4 + $0x68] sm:$0xff] %v388_v26  ;;  %v381_v29 = vmax.f32 %v365_v27, 0.0  ;;  %v290_v30 = vadd.f32 %v760_v0, %v289_v28  ;;  %v338_v31 = vpop.f32.mrf.mxu3 }
  0xd6   :  { %v271_v33 = vpop.f32.mrf.mxu0 }
  0xd7   :  { %397 = vst [vmem:[%s878_s4 + $0x30] sm:$0xff] %v381_v29  ;;  %v339_v34 = vadd.f32 %v338_v31, %v290_v30  ;;  %v272_v35 = vadd.f32 %v760_v0, %v271_v33  ;;  %v320_v36 = vpop.f32.mrf.mxu1 }
  0xd9   :  { %v373_v38 = vadd.f32 %v357_v32, %v339_v34  ;;  %v321_v39 = vadd.f32 %v320_v36, %v272_v35 }
  0xdb   :  { %v389_v40 = vmax.f32 %v373_v38, 0.0  ;;  %v366_v41 = vadd.f32 %v350_v37, %v321_v39 }
  0xdc   :  { %v291_v42 = vpop.f32.mrf.mxu2 }
  0xdd   :  { %405 = vst [vmem:[%s878_s4 + $0x70] sm:$0xff] %v389_v40  ;;  %v382_v43 = vmax.f32 %v366_v41, 0.0  ;;  %v292_v44 = vadd.f32 %v760_v0, %v291_v42  ;;  %v340_v45 = vpop.f32.mrf.mxu3 }
  0xdf   :  { %398 = vst [vmem:[%s878_s4 + $0x38] sm:$0xff] %v382_v43  ;;  %v341_v47 = vadd.f32 %v340_v45, %v292_v44 }
  0xe1   :  { %v374_v48 = vadd.f32 %v358_v46, %v341_v47 }
  0xe3   :  { %v390_v49 = vmax.f32 %v374_v48, 0.0 }
  0xe5   :  { %406 = vst [vmem:[%s878_s4 + $0x78] sm:$0xff] %v390_v49 }

// kernel: rand_aug_resnet_eval.9
= control target key start
LH: loop header
LB: loop body
LE: loop exit
PB: predicated region body
PF: predicated region fallthrough
CT: control target
= control target key end

     0   :  { %vm31_vm0 = vcmask 130048   ;;  %s253_s0 = inlined_call_operand.vmem [shape: f32[2,64,16], index: 0, kind: input, shape index: {}]   ;;  %s254_s1 = inlined_call_operand.vmem [shape: f32[16,10], index: 1, kind: input, shape index: {}]   ;;  %s255_s2 = inlined_call_operand.vmem [shape: f32[1,10], index: 2, kind: input, shape index: {}]   ;;  %s256_s3 = inlined_call_operand.hbm [shape: f32[2,10], index: 3, kind: output, shape index: {}]  }
   0x1   :  { %v77_v0 = vld [vmem:[%s254_s1 + $0x8] sm:$0xff]  ;;  %v76_v1 = vld [vmem:[%s254_s1] sm:$0xff]  ;;  %v17_v4 = vld [vmem:[%s253_s0 + $0x10] sm:$0xff] }
   0x2   :  { %v15_v2 = vld [vmem:[%s253_s0] sm:$0xff]  ;;  %102 = vmatpush.msra.mxu0 %v77_v0  ;;  %v16_v3 = vld [vmem:[%s253_s0 + $0x8] sm:$0xff]  ;;  %v18_v5 = vld [vmem:[%s253_s0 + $0x18] sm:$0xff]  ;;  %v35_v8 = vsel %vm31_vm0, %v17_v4, 0.0 }
   0x3   :  { %v32_v6 = vsel %vm31_vm0, %v15_v2, 0.0  ;;  %v33_v7 = vsel %vm31_vm0, %v16_v3, 0.0  ;;  %v19_v9 = vld [vmem:[%s253_s0 + $0x20] sm:$0xff]  ;;  %v24_v11 = vld [vmem:[%s253_s0 + $0x48] sm:$0xff]  ;;  %v25_v13 = vld [vmem:[%s253_s0 + $0x50] sm:$0xff]  ;;  %v37_v15 = vsel %vm31_vm0, %v18_v5, 0.0 }
   0x4   :  { %103 = vmatpush.msra.mxu0 %v76_v1  ;;  %v23_v10 = vld [vmem:[%s253_s0 + $0x40] sm:$0xff]  ;;  %v34_v12 = vadd.f32 %v33_v7, %v32_v6  ;;  %v26_v14 = vld [vmem:[%s253_s0 + $0x58] sm:$0xff]  ;;  %v54_v17 = vsel %vm31_vm0, %v24_v11, 0.0  ;;  %v20_v18 = vld [vmem:[%s253_s0 + $0x28] sm:$0xff]  ;;  %v56_v22 = vsel %vm31_vm0, %v25_v13, 0.0  ;;  %v39_v23 = vsel %vm31_vm0, %v19_v9, 0.0 }
   0x5   :  { %v53_v16 = vsel %vm31_vm0, %v23_v10, 0.0  ;;  %v27_v19 = vld [vmem:[%s253_s0 + $0x60] sm:$0xff]  ;;  %v58_v24 = vsel %vm31_vm0, %v26_v14, 0.0  ;;  %v21_v25 = vld [vmem:[%s253_s0 + $0x30] sm:$0xff]  ;;  %v28_v26 = vld [vmem:[%s253_s0 + $0x68] sm:$0xff] }
   0x6   :  { %v36_v20 = vadd.f32 %v35_v8, %v34_v12  ;;  %v55_v21 = vadd.f32 %v54_v17, %v53_v16 }
   0x8   :  { %v38_v27 = vadd.f32 %v37_v15, %v36_v20  ;;  %v57_v28 = vadd.f32 %v56_v22, %v55_v21 }
   0x9   :  { %8 = vsyncpa [#allocation3], 0  ;;  %v41_v29 = vsel %vm31_vm0, %v20_v18, 0.0  ;;  %v60_v30 = vsel %vm31_vm0, %v27_v19, 0.0  ;;  %v22_v31 = vld [vmem:[%s253_s0 + $0x38] sm:$0xff]  ;;  %v29_v32 = vld [vmem:[%s253_s0 + $0x70] sm:$0xff] }
   0xa   :  { %v40_v33 = vadd.f32 %v39_v23, %v38_v27  ;;  %v59_v34 = vadd.f32 %v58_v24, %v57_v28  ;;  %v43_v35 = vsel %vm31_vm0, %v21_v25, 0.0  ;;  %v62_v36 = vsel %vm31_vm0, %v28_v26, 0.0  ;;  %v30_v37 = vld [vmem:[%s253_s0 + $0x78] sm:$0xff]  ;;  %v128_v63 = vld [vmem:[%s255_s2] ss:$0 sm:$0xff]  ;;  %s155_s21 = smov [#allocation2]  }
   0xb   :  { %v45_v40 = vsel %vm31_vm0, %v22_v31, 0.0  ;;  %v64_v41 = vsel %vm31_vm0, %v29_v32, 0.0  ;;  %v66_v44 = vsel %vm31_vm0, %v30_v37, 0.0  ;;  %vm84_vm1 = vcmask 1041409   ;;  %s115_s22 = sshll.u32 %s155_s21, 4  ;;  %s117_s24 = sshll.u32 %s256_s3, 4  ;;  %s116_s22 = int_to_ptr.vmem [resolvable:$true] %s115_s22  ;;  %s118_s24 = int_to_ptr.hbm [resolvable:$true] %s117_s24 }
   0xc   :  { %v42_v38 = vadd.f32 %v41_v29, %v40_v33  ;;  %v61_v39 = vadd.f32 %v60_v30, %v59_v34  ;;  %vm108_vm2 = vcmask 74752  }
   0xe   :  { %v44_v42 = vadd.f32 %v43_v35, %v42_v38  ;;  %v63_v43 = vadd.f32 %v62_v36, %v61_v39 }
  0x10   :  { %v46_v45 = vadd.f32 %v45_v40, %v44_v42  ;;  %v65_v46 = vadd.f32 %v64_v41, %v63_v43 }
  0x12   :  { %v47_v47 = vrot.slane %v46_v45, 4  ;;  %v67_v48 = vadd.f32 %v66_v44, %v65_v46 }
  0x14   :  { %v48_v49 = vadd.f32 %v47_v47, %v46_v45  ;;  %v68_v50 = vrot.slane %v67_v48, 4 }
  0x16   :  { %v49_v51 = vrot.slane %v48_v49, 2  ;;  %v69_v52 = vadd.f32 %v68_v50, %v67_v48 }
  0x18   :  { %v50_v53 = vadd.f32 %v49_v51, %v48_v49  ;;  %v70_v54 = vrot.slane %v69_v52, 2 }
  0x1a   :  { %v51_v55 = vrot.slane %v50_v53, 1  ;;  %v71_v56 = vadd.f32 %v70_v54, %v69_v52 }
  0x1c   :  { %v52_v57 = vadd.f32 %v51_v55, %v50_v53  ;;  %v72_v58 = vrot.slane %v71_v56, 1 }
  0x1e   :  { %v73_v59 = vadd.f32 %v72_v58, %v71_v56  ;;  %v74_v60 = vmul.f32 0.015625, %v52_v57 }
  0x20   :  { %v75_v61 = vmul.f32 0.015625, %v73_v59 }
  0x22   :  { %v85_v62 = vsel %vm84_vm1, %v75_v61, %v74_v60 }
  0x23   :  { %126 = vmatmul.msk.f32.vlgmr.msra.gmra.mxu0 %vm31_vm0, %v85_v62 }
  0xa0   :  { %v105_v0 = vpop.f32.mrf.mxu0 }
  0xa1   :  { %v106_v1 = vadd.f32 %v128_v63, %v105_v0 }
  0xa3   :  { %109 = vst.msk [vmem:[#allocation2] sm:$0x3] %vm108_vm2, %v106_v1 }
  0xa4   :  { %120 = dma.vmem_to_hbm [thread:$0]  %s116_s22, 32, %s118_s24, [#allocation3]  }
  0xa5   :  { %153 = dma.done.wait [#allocation3], 32  }
  0xa6   :  { %154 = vsyncadd [#allocation3], 4294967264 }
  0xa7   :  { %125 = vsyncpa [#allocation3], 1 }

</bundles_post_ra>
